<compile_context>
chip_gen: v7x
topology: tpu7x:2x2x1
jax: 0.10.0
libtpu: 0.0.40
codegen_flags: <defaults>
</compile_context>

<pallas_src>
import functools

import jax
import jax.numpy as jnp
from jax.experimental import pallas as pl
from jax.experimental.pallas import tpu as pltpu


# ----------------------------------------------------------------------------
# Single fused Pallas kernel
# ----------------------------------------------------------------------------
def _gmc_fused_kernel(*refs, num_blocks):
    f32 = jnp.float32
    bf16 = jnp.bfloat16

    x_ref, batch_ref, seq_emb_ref, domain_ref = refs[:4]
    block_refs = refs[4:4 + num_blocks]
    (wps, bps, wpq, bpq, wpd, bpd,
     wss, bss, wcp, bcp,
     wc1, bc1, wc2, bc2,
     wd1, bd1, wd2, bd2,
     out_ref) = refs[4 + num_blocks:]

    def mm(a, w_ref, b_ref=None, relu=False):
        acc = jnp.dot(a.astype(bf16), w_ref[...].astype(bf16),
                      preferred_element_type=f32)
        if b_ref is not None:
            acc = acc + b_ref[...]
        if relu:
            acc = jnp.maximum(acc, 0.0)
        return acc

    def cat_mm(parts, w_ref, b_ref):
        # (cat(parts, axis=-1) @ W + b) without materializing the concat:
        # split-K partial dots against row-slices of the weight.
        acc = b_ref[...].astype(f32)
        k0 = 0
        for part in parts:
            k1 = k0 + part.shape[1]
            acc = acc + jnp.dot(part.astype(bf16), w_ref[k0:k1, :].astype(bf16),
                                preferred_element_type=f32)
            k0 = k1
        return acc

    # ---- block stack (simplified BasicBlock = linear + ReLU) ---------------
    h = x_ref[...].astype(f32)
    for i, w_ref in enumerate(block_refs):
        h = mm(h, w_ref, relu=True)
        if (i % 2 == 1) and (i != num_blocks - 1):
            # local_mean_pool: average consecutive node pairs via an in-kernel
            # 0.5-valued pooling matrix (MXU), keeping everything in VMEM.
            n = h.shape[0]
            nh = n // 2
            r = jax.lax.broadcasted_iota(jnp.int32, (nh, n), 0)
            c = jax.lax.broadcasted_iota(jnp.int32, (nh, n), 1)
            pair = jnp.where((c == 2 * r) | (c == 2 * r + 1), 0.5, 0.0)
            h = jnp.dot(pair.astype(bf16), h.astype(bf16),
                        preferred_element_type=f32)

    # ---- global_mean_pool(x, batch): in-kernel one-hot segment mean --------
    nf = h.shape[0]
    nb = out_ref.shape[0]
    seg = batch_ref[...]                                       # (1, NF) int32
    gid = jax.lax.broadcasted_iota(jnp.int32, (nb, nf), 0)
    onehot = (gid == jnp.broadcast_to(seg, (nb, nf))).astype(f32)
    counts = jnp.maximum(jnp.sum(onehot, axis=1, keepdims=True), 1.0)
    pooled = jnp.dot(onehot.astype(bf16), h.astype(bf16),
                     preferred_element_type=f32) / counts      # (B, C_last)

    # ---- modality projectors (each computed exactly once) ------------------
    struct_f = mm(pooled, wps, bps)                            # (B, P)
    seq_f = mm(seq_emb_ref[...], wpq, bpq)                     # (B, P)
    dom_f = mm(domain_ref[...], wpd, bpd)                      # (B, P)

    # ---- struct_seq / complete projectors -----------------------------------
    h_ss = cat_mm([struct_f, seq_f], wss, bss)                 # (B, P)
    h_cp = cat_mm([struct_f, seq_f, dom_f], wcp, bcp)          # (B, P)

    # ---- classifier MLPs (Linear -> BN(eval id) -> ReLU -> Dropout(id) -> Linear)
    out_incomplete = mm(mm(h_ss, wd1, bd1, relu=True), wd2, bd2)   # classifier2
    out_complete = mm(mm(h_cp, wc1, bc1, relu=True), wc2, bc2)     # classifier

    # out[domain_index] = complete path; others keep the incomplete path.
    has_domain = jnp.sum(domain_ref[...], axis=-1, keepdims=True) != 0.0
    out_ref[...] = jnp.where(has_domain, out_complete,
                             out_incomplete).astype(out_ref.dtype)


def _full_block(a):
    zeros = (0,) * a.ndim
    return pl.BlockSpec(a.shape, lambda i, _z=zeros: _z)


# ----------------------------------------------------------------------------
# Parameter init (deterministic, in-script; no checkpoint loading)
# ----------------------------------------------------------------------------
def init_params(key, embedding_dim, channels, seq_emb_dim, domain_dim, num_classes):
    proj_dim = max(channels[-1], seq_emb_dim, domain_dim)
    mid = max(proj_dim, num_classes)
    keys = iter(jax.random.split(key, 32))

    def lin_w(fan_in, fan_out):
        k = next(keys)
        w = jax.random.normal(k, (fan_in, fan_out), jnp.float32)
        return (w / jnp.sqrt(jnp.float32(fan_in))).astype(jnp.bfloat16)

    def bias(n):
        return jnp.zeros((1, n), jnp.float32)

    p = {}
    p["embedding"] = 0.02 * jax.random.normal(next(keys), (21, embedding_dim),
                                              jnp.float32)

    blocks = []
    in_c = embedding_dim
    for c in channels:
        blocks.append(lin_w(in_c, c))   # BasicBlock(r, ..., in_c -> c), simplified
        blocks.append(lin_w(c, c))      # BasicBlock(r, ..., c -> c), simplified
        in_c = c
    p["blocks"] = blocks

    p["proj_struct_w"] = lin_w(channels[-1], proj_dim); p["proj_struct_b"] = bias(proj_dim)
    p["proj_seq_w"] = lin_w(seq_emb_dim, proj_dim);     p["proj_seq_b"] = bias(proj_dim)
    p["proj_domain_w"] = lin_w(domain_dim, proj_dim);   p["proj_domain_b"] = bias(proj_dim)

    p["ss_proj_w"] = lin_w(2 * proj_dim, proj_dim);     p["ss_proj_b"] = bias(proj_dim)
    p["comp_proj_w"] = lin_w(3 * proj_dim, proj_dim);   p["comp_proj_b"] = bias(proj_dim)

    p["cls1_w1"] = lin_w(proj_dim, mid); p["cls1_b1"] = bias(mid)          # classifier
    p["cls1_w2"] = lin_w(mid, num_classes); p["cls1_b2"] = bias(num_classes)
    p["cls2_w1"] = lin_w(proj_dim, mid); p["cls2_b1"] = bias(mid)          # classifier2
    p["cls2_w2"] = lin_w(mid, num_classes); p["cls2_b2"] = bias(num_classes)
    return p


# ----------------------------------------------------------------------------
# Forward pass (inference path of Model_GMC.forward, all_loss=None)
# ----------------------------------------------------------------------------
def model_gmc_forward(params, tokens, pos, seq, ori, domain, seq_emb, batch,
                      num_graphs):
    # pos / seq / ori are only consumed by the geometric conv, which is
    # approximated per-node here -> intentionally unused (dead work removed).
    del pos, seq, ori

    num_blocks = len(params["blocks"])
    num_pool = num_blocks // 2 - 1                      # pair-pool stages

    # embedding lookup (tiny XLA gather; glue outside the kernel)
    x = jnp.take(params["embedding"], tokens, axis=0).astype(jnp.bfloat16)

    # graph ids after the pair-pool subsampling, laid out lane-major (1, NF)
    batch_final = batch[:: 2 ** num_pool].astype(jnp.int32).reshape(1, -1)

    num_classes = params["cls1_w2"].shape[1]

    args = [
        x, batch_final,
        seq_emb.astype(jnp.float32), domain.astype(jnp.float32),
        *params["blocks"],
        params["proj_struct_w"], params["proj_struct_b"],
        params["proj_seq_w"], params["proj_seq_b"],
        params["proj_domain_w"], params["proj_domain_b"],
        params["ss_proj_w"], params["ss_proj_b"],
        params["comp_proj_w"], params["comp_proj_b"],
        params["cls1_w1"], params["cls1_b1"], params["cls1_w2"], params["cls1_b2"],
        params["cls2_w1"], params["cls2_b1"], params["cls2_w2"], params["cls2_b2"],
    ]

    # Single fused kernel; all tensors are small enough to sit in VMEM at once.
    # TODO(synk): at production graph sizes, add a parallel M (nodes) grid axis
    #             and scalar-prefetched segment offsets for the pooling.
    return pl.pallas_call(
        functools.partial(_gmc_fused_kernel, num_blocks=num_blocks),
        out_shape=jax.ShapeDtypeStruct((num_graphs, num_classes), jnp.float32),
        grid=(1,),
        in_specs=[_full_block(a) for a in args],
        out_specs=pl.BlockSpec((num_graphs, num_classes), lambda i: (0, 0)),
        compiler_params=pltpu.CompilerParams(dimension_semantics=("arbitrary",)),
    )(*args)


# ----------------------------------------------------------------------------
if __name__ == "__main__":
    # small, forward-consistent, lane-friendly shapes
    N_NODES = 64        # total nodes across graphs
    B = 2               # graphs in the batch
    EMB_DIM = 16        # embedding_dim
    CHANNELS = (64, 128)
    SEQ_EMB_DIM = 32
    DOMAIN_DIM = 16
    NUM_CLASSES = 128   # -> proj_dim = mid = num_classes = 128 (lane-dense)

    key = jax.random.PRNGKey(0)
    k_params, k_data = jax.random.split(key)
    params = init_params(k_params, EMB_DIM, CHANNELS, SEQ_EMB_DIM, DOMAIN_DIM,
                         NUM_CLASSES)

    ks = jax.random.split(k_data, 6)
    tokens = jax.random.randint(ks[0], (N_NODES,), 0, 21)                 # data.x
    pos = jax.random.normal(ks[1], (N_NODES, 3), jnp.float32)             # data.pos
    seq = jnp.arange(N_NODES, dtype=jnp.float32)                          # data.seq
    ori = jax.random.normal(ks[2], (N_NODES, 3), jnp.float32)             # data.ori
    seq_emb = jax.random.normal(ks[3], (B, SEQ_EMB_DIM), jnp.float32)     # data.seq_emb
    # graph 0 has a domain vector, graph 1 does not (exercises both branches)
    domain = jnp.concatenate(
        [jax.random.normal(ks[4], (1, DOMAIN_DIM), jnp.float32),
         jnp.zeros((1, DOMAIN_DIM), jnp.float32)], axis=0)                # data.domain
    batch = jnp.concatenate(
        [jnp.zeros(N_NODES // 2, jnp.int32),
         jnp.ones(N_NODES // 2, jnp.int32)])                              # data.batch

    fwd = jax.jit(functools.partial(model_gmc_forward, num_graphs=B))
    out = fwd(params, tokens, pos, seq, ori, domain, seq_emb, batch)
    out = jax.block_until_ready(out)
    assert out.shape == (B, NUM_CLASSES), out.shape
    assert bool(jnp.all(jnp.isfinite(out)))
    print("KERNEL_OK")
</pallas_src>

<mosaic_0001>
module attributes {stable_mosaic.version = 11 : i64} {
  func.func @_gmc_fused_kernel(%arg0: i32, %arg1: memref<64x16xbf16, #tpu.memory_space<vmem>>, %arg2: memref<1x32xi32, #tpu.memory_space<vmem>>, %arg3: memref<2x32xf32, #tpu.memory_space<vmem>>, %arg4: memref<2x16xf32, #tpu.memory_space<vmem>>, %arg5: memref<16x64xbf16, #tpu.memory_space<vmem>>, %arg6: memref<64x64xbf16, #tpu.memory_space<vmem>>, %arg7: memref<64x128xbf16, #tpu.memory_space<vmem>>, %arg8: memref<128x128xbf16, #tpu.memory_space<vmem>>, %arg9: memref<128x128xbf16, #tpu.memory_space<vmem>>, %arg10: memref<1x128xf32, #tpu.memory_space<vmem>>, %arg11: memref<32x128xbf16, #tpu.memory_space<vmem>>, %arg12: memref<1x128xf32, #tpu.memory_space<vmem>>, %arg13: memref<16x128xbf16, #tpu.memory_space<vmem>>, %arg14: memref<1x128xf32, #tpu.memory_space<vmem>>, %arg15: memref<256x128xbf16, #tpu.memory_space<vmem>>, %arg16: memref<1x128xf32, #tpu.memory_space<vmem>>, %arg17: memref<384x128xbf16, #tpu.memory_space<vmem>>, %arg18: memref<1x128xf32, #tpu.memory_space<vmem>>, %arg19: memref<128x128xbf16, #tpu.memory_space<vmem>>, %arg20: memref<1x128xf32, #tpu.memory_space<vmem>>, %arg21: memref<128x128xbf16, #tpu.memory_space<vmem>>, %arg22: memref<1x128xf32, #tpu.memory_space<vmem>>, %arg23: memref<128x128xbf16, #tpu.memory_space<vmem>>, %arg24: memref<1x128xf32, #tpu.memory_space<vmem>>, %arg25: memref<128x128xbf16, #tpu.memory_space<vmem>>, %arg26: memref<1x128xf32, #tpu.memory_space<vmem>>, %arg27: memref<2x128xf32, #tpu.memory_space<vmem>>) attributes {dimension_semantics = [#tpu.dimension_semantics<arbitrary>], iteration_bounds = array<i64: 1>, scalar_prefetch = 0 : i64, scratch_operands = 0 : i64, tpu.core_type = #tpu.core_type<tc>, window_params = [{pipeline_mode = #tpu.pipeline_mode<synchronous>, transform_indices = @transform_0, window_bounds = array<i64: 64, 16>}, {pipeline_mode = #tpu.pipeline_mode<synchronous>, transform_indices = @transform_1, window_bounds = array<i64: 1, 32>}, {pipeline_mode = #tpu.pipeline_mode<synchronous>, transform_indices = @transform_2, window_bounds = array<i64: 2, 32>}, {pipeline_mode = #tpu.pipeline_mode<synchronous>, transform_indices = @transform_3, window_bounds = array<i64: 2, 16>}, {pipeline_mode = #tpu.pipeline_mode<synchronous>, transform_indices = @transform_4, window_bounds = array<i64: 16, 64>}, {pipeline_mode = #tpu.pipeline_mode<synchronous>, transform_indices = @transform_5, window_bounds = array<i64: 64, 64>}, {pipeline_mode = #tpu.pipeline_mode<synchronous>, transform_indices = @transform_6, window_bounds = array<i64: 64, 128>}, {pipeline_mode = #tpu.pipeline_mode<synchronous>, transform_indices = @transform_7, window_bounds = array<i64: 128, 128>}, {pipeline_mode = #tpu.pipeline_mode<synchronous>, transform_indices = @transform_8, window_bounds = array<i64: 128, 128>}, {pipeline_mode = #tpu.pipeline_mode<synchronous>, transform_indices = @transform_9, window_bounds = array<i64: 1, 128>}, {pipeline_mode = #tpu.pipeline_mode<synchronous>, transform_indices = @transform_10, window_bounds = array<i64: 32, 128>}, {pipeline_mode = #tpu.pipeline_mode<synchronous>, transform_indices = @transform_11, window_bounds = array<i64: 1, 128>}, {pipeline_mode = #tpu.pipeline_mode<synchronous>, transform_indices = @transform_12, window_bounds = array<i64: 16, 128>}, {pipeline_mode = #tpu.pipeline_mode<synchronous>, transform_indices = @transform_13, window_bounds = array<i64: 1, 128>}, {pipeline_mode = #tpu.pipeline_mode<synchronous>, transform_indices = @transform_14, window_bounds = array<i64: 256, 128>}, {pipeline_mode = #tpu.pipeline_mode<synchronous>, transform_indices = @transform_15, window_bounds = array<i64: 1, 128>}, {pipeline_mode = #tpu.pipeline_mode<synchronous>, transform_indices = @transform_16, window_bounds = array<i64: 384, 128>}, {pipeline_mode = #tpu.pipeline_mode<synchronous>, transform_indices = @transform_17, window_bounds = array<i64: 1, 128>}, {pipeline_mode = #tpu.pipeline_mode<synchronous>, transform_indices = @transform_18, window_bounds = array<i64: 128, 128>}, {pipeline_mode = #tpu.pipeline_mode<synchronous>, transform_indices = @transform_19, window_bounds = array<i64: 1, 128>}, {pipeline_mode = #tpu.pipeline_mode<synchronous>, transform_indices = @transform_20, window_bounds = array<i64: 128, 128>}, {pipeline_mode = #tpu.pipeline_mode<synchronous>, transform_indices = @transform_21, window_bounds = array<i64: 1, 128>}, {pipeline_mode = #tpu.pipeline_mode<synchronous>, transform_indices = @transform_22, window_bounds = array<i64: 128, 128>}, {pipeline_mode = #tpu.pipeline_mode<synchronous>, transform_indices = @transform_23, window_bounds = array<i64: 1, 128>}, {pipeline_mode = #tpu.pipeline_mode<synchronous>, transform_indices = @transform_24, window_bounds = array<i64: 128, 128>}, {pipeline_mode = #tpu.pipeline_mode<synchronous>, transform_indices = @transform_25, window_bounds = array<i64: 1, 128>}, {pipeline_mode = #tpu.pipeline_mode<synchronous>, transform_indices = @transform_26, window_bounds = array<i64: 2, 128>}]} {
    %c0 = arith.constant 0 : index
    %c0_0 = arith.constant 0 : index
    %0 = vector.load %arg1[%c0, %c0_0] : memref<64x16xbf16, #tpu.memory_space<vmem>>, vector<64x16xbf16>
    %1 = arith.extf %0 : vector<64x16xbf16> to vector<64x16xf32>
    %2 = arith.truncf %1 : vector<64x16xf32> to vector<64x16xbf16>
    %c0_1 = arith.constant 0 : index
    %c0_2 = arith.constant 0 : index
    %3 = vector.load %arg5[%c0_1, %c0_2] : memref<16x64xbf16, #tpu.memory_space<vmem>>, vector<16x64xbf16>
    %cst = arith.constant dense<0.000000e+00> : vector<64x64xf32>
    %4 = tpu.matmul %2, %3, %cst {dimension_numbers = #tpu.dot_dimension_numbers<[1], [0], [0], [1], [0, 0, 1, 1], [], []>} : vector<64x16xbf16>, vector<16x64xbf16>, vector<64x64xf32> -> vector<64x64xf32>
    %cst_3 = arith.constant 0.000000e+00 : f32
    %5 = vector.broadcast %cst_3 : f32 to vector<64x64xf32>
    %6 = arith.maximumf %4, %5 : vector<64x64xf32>
    %7 = arith.truncf %6 : vector<64x64xf32> to vector<64x64xbf16>
    %c0_4 = arith.constant 0 : index
    %c0_5 = arith.constant 0 : index
    %8 = vector.load %arg6[%c0_4, %c0_5] : memref<64x64xbf16, #tpu.memory_space<vmem>>, vector<64x64xbf16>
    %cst_6 = arith.constant dense<0.000000e+00> : vector<64x64xf32>
    %9 = tpu.matmul %7, %8, %cst_6 {dimension_numbers = #tpu.dot_dimension_numbers<[1], [0], [0], [1], [0, 0, 1, 1], [], []>} : vector<64x64xbf16>, vector<64x64xbf16>, vector<64x64xf32> -> vector<64x64xf32>
    %cst_7 = arith.constant 0.000000e+00 : f32
    %10 = vector.broadcast %cst_7 : f32 to vector<64x64xf32>
    %11 = arith.maximumf %9, %10 : vector<64x64xf32>
    %12 = tpu.iota {dimensions = array<i32: 0>} : vector<32x64xi32>
    %13 = tpu.iota {dimensions = array<i32: 1>} : vector<32x64xi32>
    %c2_i32 = arith.constant 2 : i32
    %14 = vector.broadcast %c2_i32 : i32 to vector<32x64xi32>
    %15 = arith.muli %14, %12 : vector<32x64xi32>
    %16 = arith.cmpi eq, %13, %15 : vector<32x64xi32>
    %c2_i32_8 = arith.constant 2 : i32
    %17 = vector.broadcast %c2_i32_8 : i32 to vector<32x64xi32>
    %18 = arith.muli %17, %12 : vector<32x64xi32>
    %c1_i32 = arith.constant 1 : i32
    %19 = vector.broadcast %c1_i32 : i32 to vector<32x64xi32>
    %20 = arith.addi %18, %19 : vector<32x64xi32>
    %21 = arith.cmpi eq, %13, %20 : vector<32x64xi32>
    %22 = arith.ori %16, %21 : vector<32x64xi1>
    %cst_9 = arith.constant 5.000000e-01 : f32
    %cst_10 = arith.constant 0.000000e+00 : f32
    %23 = vector.broadcast %cst_9 : f32 to vector<32x64xf32>
    %24 = vector.broadcast %cst_10 : f32 to vector<32x64xf32>
    %25 = arith.select %22, %23, %24 : vector<32x64xi1>, vector<32x64xf32>
    %26 = arith.truncf %25 : vector<32x64xf32> to vector<32x64xbf16>
    %27 = arith.truncf %11 : vector<64x64xf32> to vector<64x64xbf16>
    %cst_11 = arith.constant dense<0.000000e+00> : vector<32x64xf32>
    %28 = tpu.matmul %26, %27, %cst_11 {dimension_numbers = #tpu.dot_dimension_numbers<[1], [0], [0], [1], [0, 0, 1, 1], [], []>} : vector<32x64xbf16>, vector<64x64xbf16>, vector<32x64xf32> -> vector<32x64xf32>
    %29 = arith.truncf %28 : vector<32x64xf32> to vector<32x64xbf16>
    %c0_12 = arith.constant 0 : index
    %c0_13 = arith.constant 0 : index
    %30 = vector.load %arg7[%c0_12, %c0_13] : memref<64x128xbf16, #tpu.memory_space<vmem>>, vector<64x128xbf16>
    %cst_14 = arith.constant dense<0.000000e+00> : vector<32x128xf32>
    %31 = tpu.matmul %29, %30, %cst_14 {dimension_numbers = #tpu.dot_dimension_numbers<[1], [0], [0], [1], [0, 0, 1, 1], [], []>} : vector<32x64xbf16>, vector<64x128xbf16>, vector<32x128xf32> -> vector<32x128xf32>
    %cst_15 = arith.constant 0.000000e+00 : f32
    %32 = vector.broadcast %cst_15 : f32 to vector<32x128xf32>
    %33 = arith.maximumf %31, %32 : vector<32x128xf32>
    %34 = arith.truncf %33 : vector<32x128xf32> to vector<32x128xbf16>
    %c0_16 = arith.constant 0 : index
    %c0_17 = arith.constant 0 : index
    %35 = vector.load %arg8[%c0_16, %c0_17] : memref<128x128xbf16, #tpu.memory_space<vmem>>, vector<128x128xbf16>
    %cst_18 = arith.constant dense<0.000000e+00> : vector<32x128xf32>
    %36 = tpu.matmul %34, %35, %cst_18 {dimension_numbers = #tpu.dot_dimension_numbers<[1], [0], [0], [1], [0, 0, 1, 1], [], []>} : vector<32x128xbf16>, vector<128x128xbf16>, vector<32x128xf32> -> vector<32x128xf32>
    %cst_19 = arith.constant 0.000000e+00 : f32
    %37 = vector.broadcast %cst_19 : f32 to vector<32x128xf32>
    %38 = arith.maximumf %36, %37 : vector<32x128xf32>
    %c0_20 = arith.constant 0 : index
    %c0_21 = arith.constant 0 : index
    %39 = vector.load %arg2[%c0_20, %c0_21] : memref<1x32xi32, #tpu.memory_space<vmem>>, vector<1x32xi32>
    %40 = tpu.iota {dimensions = array<i32: 0>} : vector<2x32xi32>
    %41 = vector.shape_cast %39 : vector<1x32xi32> to vector<1x32xi32>
    %42 = vector.broadcast %41 : vector<1x32xi32> to vector<2x32xi32>
    %43 = arith.cmpi eq, %40, %42 : vector<2x32xi32>
    %44 = arith.extui %43 : vector<2x32xi1> to vector<2x32xi32>
    %45 = arith.sitofp %44 : vector<2x32xi32> to vector<2x32xf32>
    %cst_22 = arith.constant dense<0.000000e+00> : vector<2xf32>
    %46 = vector.multi_reduction <add>, %45, %cst_22 [1] : vector<2x32xf32> to vector<2xf32>
    %47 = vector.shape_cast %46 : vector<2xf32> to vector<2x1xf32>
    %cst_23 = arith.constant 1.000000e+00 : f32
    %48 = vector.broadcast %cst_23 : f32 to vector<2x1xf32>
    %49 = arith.maximumf %47, %48 : vector<2x1xf32>
    %50 = arith.truncf %45 : vector<2x32xf32> to vector<2x32xbf16>
    %51 = arith.truncf %38 : vector<32x128xf32> to vector<32x128xbf16>
    %cst_24 = arith.constant dense<0.000000e+00> : vector<2x128xf32>
    %52 = tpu.matmul %50, %51, %cst_24 {dimension_numbers = #tpu.dot_dimension_numbers<[1], [0], [0], [1], [0, 0, 1, 1], [], []>} : vector<2x32xbf16>, vector<32x128xbf16>, vector<2x128xf32> -> vector<2x128xf32>
    %53 = vector.broadcast %49 : vector<2x1xf32> to vector<2x128xf32>
    %54 = arith.divf %52, %53 : vector<2x128xf32>
    %55 = arith.truncf %54 : vector<2x128xf32> to vector<2x128xbf16>
    %c0_25 = arith.constant 0 : index
    %c0_26 = arith.constant 0 : index
    %56 = vector.load %arg9[%c0_25, %c0_26] : memref<128x128xbf16, #tpu.memory_space<vmem>>, vector<128x128xbf16>
    %cst_27 = arith.constant dense<0.000000e+00> : vector<2x128xf32>
    %57 = tpu.matmul %55, %56, %cst_27 {dimension_numbers = #tpu.dot_dimension_numbers<[1], [0], [0], [1], [0, 0, 1, 1], [], []>} : vector<2x128xbf16>, vector<128x128xbf16>, vector<2x128xf32> -> vector<2x128xf32>
    %c0_28 = arith.constant 0 : index
    %c0_29 = arith.constant 0 : index
    %58 = vector.load %arg10[%c0_28, %c0_29] : memref<1x128xf32, #tpu.memory_space<vmem>>, vector<1x128xf32>
    %59 = vector.broadcast %58 : vector<1x128xf32> to vector<2x128xf32>
    %60 = arith.addf %57, %59 : vector<2x128xf32>
    %c0_30 = arith.constant 0 : index
    %c0_31 = arith.constant 0 : index
    %61 = vector.load %arg3[%c0_30, %c0_31] : memref<2x32xf32, #tpu.memory_space<vmem>>, vector<2x32xf32>
    %62 = arith.truncf %61 : vector<2x32xf32> to vector<2x32xbf16>
    %c0_32 = arith.constant 0 : index
    %c0_33 = arith.constant 0 : index
    %63 = vector.load %arg11[%c0_32, %c0_33] : memref<32x128xbf16, #tpu.memory_space<vmem>>, vector<32x128xbf16>
    %cst_34 = arith.constant dense<0.000000e+00> : vector<2x128xf32>
    %64 = tpu.matmul %62, %63, %cst_34 {dimension_numbers = #tpu.dot_dimension_numbers<[1], [0], [0], [1], [0, 0, 1, 1], [], []>} : vector<2x32xbf16>, vector<32x128xbf16>, vector<2x128xf32> -> vector<2x128xf32>
    %c0_35 = arith.constant 0 : index
    %c0_36 = arith.constant 0 : index
    %65 = vector.load %arg12[%c0_35, %c0_36] : memref<1x128xf32, #tpu.memory_space<vmem>>, vector<1x128xf32>
    %66 = vector.broadcast %65 : vector<1x128xf32> to vector<2x128xf32>
    %67 = arith.addf %64, %66 : vector<2x128xf32>
    %c0_37 = arith.constant 0 : index
    %c0_38 = arith.constant 0 : index
    %68 = vector.load %arg4[%c0_37, %c0_38] : memref<2x16xf32, #tpu.memory_space<vmem>>, vector<2x16xf32>
    %69 = arith.truncf %68 : vector<2x16xf32> to vector<2x16xbf16>
    %c0_39 = arith.constant 0 : index
    %c0_40 = arith.constant 0 : index
    %70 = vector.load %arg13[%c0_39, %c0_40] : memref<16x128xbf16, #tpu.memory_space<vmem>>, vector<16x128xbf16>
    %cst_41 = arith.constant dense<0.000000e+00> : vector<2x128xf32>
    %71 = tpu.matmul %69, %70, %cst_41 {dimension_numbers = #tpu.dot_dimension_numbers<[1], [0], [0], [1], [0, 0, 1, 1], [], []>} : vector<2x16xbf16>, vector<16x128xbf16>, vector<2x128xf32> -> vector<2x128xf32>
    %c0_42 = arith.constant 0 : index
    %c0_43 = arith.constant 0 : index
    %72 = vector.load %arg14[%c0_42, %c0_43] : memref<1x128xf32, #tpu.memory_space<vmem>>, vector<1x128xf32>
    %73 = vector.broadcast %72 : vector<1x128xf32> to vector<2x128xf32>
    %74 = arith.addf %71, %73 : vector<2x128xf32>
    %c0_44 = arith.constant 0 : index
    %c0_45 = arith.constant 0 : index
    %75 = vector.load %arg16[%c0_44, %c0_45] : memref<1x128xf32, #tpu.memory_space<vmem>>, vector<1x128xf32>
    %76 = arith.truncf %60 : vector<2x128xf32> to vector<2x128xbf16>
    %c0_46 = arith.constant 0 : index
    %c0_47 = arith.constant 0 : index
    %77 = vector.load %arg15[%c0_46, %c0_47] : memref<256x128xbf16, #tpu.memory_space<vmem>>, vector<128x128xbf16>
    %cst_48 = arith.constant dense<0.000000e+00> : vector<2x128xf32>
    %78 = tpu.matmul %76, %77, %cst_48 {dimension_numbers = #tpu.dot_dimension_numbers<[1], [0], [0], [1], [0, 0, 1, 1], [], []>} : vector<2x128xbf16>, vector<128x128xbf16>, vector<2x128xf32> -> vector<2x128xf32>
    %79 = vector.broadcast %75 : vector<1x128xf32> to vector<2x128xf32>
    %80 = arith.addf %79, %78 : vector<2x128xf32>
    %81 = arith.truncf %67 : vector<2x128xf32> to vector<2x128xbf16>
    %c128 = arith.constant 128 : index
    %c0_49 = arith.constant 0 : index
    %82 = vector.load %arg15[%c128, %c0_49] : memref<256x128xbf16, #tpu.memory_space<vmem>>, vector<128x128xbf16>
    %cst_50 = arith.constant dense<0.000000e+00> : vector<2x128xf32>
    %83 = tpu.matmul %81, %82, %cst_50 {dimension_numbers = #tpu.dot_dimension_numbers<[1], [0], [0], [1], [0, 0, 1, 1], [], []>} : vector<2x128xbf16>, vector<128x128xbf16>, vector<2x128xf32> -> vector<2x128xf32>
    %84 = arith.addf %80, %83 : vector<2x128xf32>
    %c0_51 = arith.constant 0 : index
    %c0_52 = arith.constant 0 : index
    %85 = vector.load %arg18[%c0_51, %c0_52] : memref<1x128xf32, #tpu.memory_space<vmem>>, vector<1x128xf32>
    %86 = arith.truncf %60 : vector<2x128xf32> to vector<2x128xbf16>
    %c0_53 = arith.constant 0 : index
    %c0_54 = arith.constant 0 : index
    %87 = vector.load %arg17[%c0_53, %c0_54] : memref<384x128xbf16, #tpu.memory_space<vmem>>, vector<128x128xbf16>
    %cst_55 = arith.constant dense<0.000000e+00> : vector<2x128xf32>
    %88 = tpu.matmul %86, %87, %cst_55 {dimension_numbers = #tpu.dot_dimension_numbers<[1], [0], [0], [1], [0, 0, 1, 1], [], []>} : vector<2x128xbf16>, vector<128x128xbf16>, vector<2x128xf32> -> vector<2x128xf32>
    %89 = vector.broadcast %85 : vector<1x128xf32> to vector<2x128xf32>
    %90 = arith.addf %89, %88 : vector<2x128xf32>
    %91 = arith.truncf %67 : vector<2x128xf32> to vector<2x128xbf16>
    %c128_56 = arith.constant 128 : index
    %c0_57 = arith.constant 0 : index
    %92 = vector.load %arg17[%c128_56, %c0_57] : memref<384x128xbf16, #tpu.memory_space<vmem>>, vector<128x128xbf16>
    %cst_58 = arith.constant dense<0.000000e+00> : vector<2x128xf32>
    %93 = tpu.matmul %91, %92, %cst_58 {dimension_numbers = #tpu.dot_dimension_numbers<[1], [0], [0], [1], [0, 0, 1, 1], [], []>} : vector<2x128xbf16>, vector<128x128xbf16>, vector<2x128xf32> -> vector<2x128xf32>
    %94 = arith.addf %90, %93 : vector<2x128xf32>
    %95 = arith.truncf %74 : vector<2x128xf32> to vector<2x128xbf16>
    %c256 = arith.constant 256 : index
    %c0_59 = arith.constant 0 : index
    %96 = vector.load %arg17[%c256, %c0_59] : memref<384x128xbf16, #tpu.memory_space<vmem>>, vector<128x128xbf16>
    %cst_60 = arith.constant dense<0.000000e+00> : vector<2x128xf32>
    %97 = tpu.matmul %95, %96, %cst_60 {dimension_numbers = #tpu.dot_dimension_numbers<[1], [0], [0], [1], [0, 0, 1, 1], [], []>} : vector<2x128xbf16>, vector<128x128xbf16>, vector<2x128xf32> -> vector<2x128xf32>
    %98 = arith.addf %94, %97 : vector<2x128xf32>
    %99 = arith.truncf %84 : vector<2x128xf32> to vector<2x128xbf16>
    %c0_61 = arith.constant 0 : index
    %c0_62 = arith.constant 0 : index
    %100 = vector.load %arg23[%c0_61, %c0_62] : memref<128x128xbf16, #tpu.memory_space<vmem>>, vector<128x128xbf16>
    %cst_63 = arith.constant dense<0.000000e+00> : vector<2x128xf32>
    %101 = tpu.matmul %99, %100, %cst_63 {dimension_numbers = #tpu.dot_dimension_numbers<[1], [0], [0], [1], [0, 0, 1, 1], [], []>} : vector<2x128xbf16>, vector<128x128xbf16>, vector<2x128xf32> -> vector<2x128xf32>
    %c0_64 = arith.constant 0 : index
    %c0_65 = arith.constant 0 : index
    %102 = vector.load %arg24[%c0_64, %c0_65] : memref<1x128xf32, #tpu.memory_space<vmem>>, vector<1x128xf32>
    %103 = vector.broadcast %102 : vector<1x128xf32> to vector<2x128xf32>
    %104 = arith.addf %101, %103 : vector<2x128xf32>
    %cst_66 = arith.constant 0.000000e+00 : f32
    %105 = vector.broadcast %cst_66 : f32 to vector<2x128xf32>
    %106 = arith.maximumf %104, %105 : vector<2x128xf32>
    %107 = arith.truncf %106 : vector<2x128xf32> to vector<2x128xbf16>
    %c0_67 = arith.constant 0 : index
    %c0_68 = arith.constant 0 : index
    %108 = vector.load %arg25[%c0_67, %c0_68] : memref<128x128xbf16, #tpu.memory_space<vmem>>, vector<128x128xbf16>
    %cst_69 = arith.constant dense<0.000000e+00> : vector<2x128xf32>
    %109 = tpu.matmul %107, %108, %cst_69 {dimension_numbers = #tpu.dot_dimension_numbers<[1], [0], [0], [1], [0, 0, 1, 1], [], []>} : vector<2x128xbf16>, vector<128x128xbf16>, vector<2x128xf32> -> vector<2x128xf32>
    %c0_70 = arith.constant 0 : index
    %c0_71 = arith.constant 0 : index
    %110 = vector.load %arg26[%c0_70, %c0_71] : memref<1x128xf32, #tpu.memory_space<vmem>>, vector<1x128xf32>
    %111 = vector.broadcast %110 : vector<1x128xf32> to vector<2x128xf32>
    %112 = arith.addf %109, %111 : vector<2x128xf32>
    %113 = arith.truncf %98 : vector<2x128xf32> to vector<2x128xbf16>
    %c0_72 = arith.constant 0 : index
    %c0_73 = arith.constant 0 : index
    %114 = vector.load %arg19[%c0_72, %c0_73] : memref<128x128xbf16, #tpu.memory_space<vmem>>, vector<128x128xbf16>
    %cst_74 = arith.constant dense<0.000000e+00> : vector<2x128xf32>
    %115 = tpu.matmul %113, %114, %cst_74 {dimension_numbers = #tpu.dot_dimension_numbers<[1], [0], [0], [1], [0, 0, 1, 1], [], []>} : vector<2x128xbf16>, vector<128x128xbf16>, vector<2x128xf32> -> vector<2x128xf32>
    %c0_75 = arith.constant 0 : index
    %c0_76 = arith.constant 0 : index
    %116 = vector.load %arg20[%c0_75, %c0_76] : memref<1x128xf32, #tpu.memory_space<vmem>>, vector<1x128xf32>
    %117 = vector.broadcast %116 : vector<1x128xf32> to vector<2x128xf32>
    %118 = arith.addf %115, %117 : vector<2x128xf32>
    %cst_77 = arith.constant 0.000000e+00 : f32
    %119 = vector.broadcast %cst_77 : f32 to vector<2x128xf32>
    %120 = arith.maximumf %118, %119 : vector<2x128xf32>
    %121 = arith.truncf %120 : vector<2x128xf32> to vector<2x128xbf16>
    %c0_78 = arith.constant 0 : index
    %c0_79 = arith.constant 0 : index
    %122 = vector.load %arg21[%c0_78, %c0_79] : memref<128x128xbf16, #tpu.memory_space<vmem>>, vector<128x128xbf16>
    %cst_80 = arith.constant dense<0.000000e+00> : vector<2x128xf32>
    %123 = tpu.matmul %121, %122, %cst_80 {dimension_numbers = #tpu.dot_dimension_numbers<[1], [0], [0], [1], [0, 0, 1, 1], [], []>} : vector<2x128xbf16>, vector<128x128xbf16>, vector<2x128xf32> -> vector<2x128xf32>
    %c0_81 = arith.constant 0 : index
    %c0_82 = arith.constant 0 : index
    %124 = vector.load %arg22[%c0_81, %c0_82] : memref<1x128xf32, #tpu.memory_space<vmem>>, vector<1x128xf32>
    %125 = vector.broadcast %124 : vector<1x128xf32> to vector<2x128xf32>
    %126 = arith.addf %123, %125 : vector<2x128xf32>
    %c0_83 = arith.constant 0 : index
    %c0_84 = arith.constant 0 : index
    %127 = vector.load %arg4[%c0_83, %c0_84] : memref<2x16xf32, #tpu.memory_space<vmem>>, vector<2x16xf32>
    %cst_85 = arith.constant dense<0.000000e+00> : vector<2xf32>
    %128 = vector.multi_reduction <add>, %127, %cst_85 [1] : vector<2x16xf32> to vector<2xf32>
    %129 = vector.shape_cast %128 : vector<2xf32> to vector<2x1xf32>
    %cst_86 = arith.constant 0.000000e+00 : f32
    %130 = vector.broadcast %cst_86 : f32 to vector<2x1xf32>
    %131 = arith.cmpf one, %129, %130 : vector<2x1xf32>
    %132 = vector.shape_cast %131 : vector<2x1xi1> to vector<2x1xi1>
    %133 = vector.broadcast %132 : vector<2x1xi1> to vector<2x128xi1>
    %134 = arith.select %133, %126, %112 : vector<2x128xi1>, vector<2x128xf32>
    %c0_87 = arith.constant 0 : index
    %c0_88 = arith.constant 0 : index
    %135 = vector.load %arg27[%c0_87, %c0_88] : memref<2x128xf32, #tpu.memory_space<vmem>>, vector<2x128xf32>
    tpu.vector_store %arg27[%c0_87, %c0_88], %134 {strides = array<i32>} : memref<2x128xf32, #tpu.memory_space<vmem>>, vector<2x128xf32>,
    return
  }
  func.func @transform_0(%arg0: i32) -> (i32, i32) {
    %c0_i32 = arith.constant 0 : i32
    %c0_i32_0 = arith.constant 0 : i32
    %c0_i32_1 = arith.constant 0 : i32
    return %c0_i32, %c0_i32_0 : i32, i32
  }
  func.func @transform_1(%arg0: i32) -> (i32, i32) {
    %c0_i32 = arith.constant 0 : i32
    %c0_i32_0 = arith.constant 0 : i32
    %c0_i32_1 = arith.constant 0 : i32
    return %c0_i32, %c0_i32_0 : i32, i32
  }
  func.func @transform_2(%arg0: i32) -> (i32, i32) {
    %c0_i32 = arith.constant 0 : i32
    %c0_i32_0 = arith.constant 0 : i32
    %c0_i32_1 = arith.constant 0 : i32
    return %c0_i32, %c0_i32_0 : i32, i32
  }
  func.func @transform_3(%arg0: i32) -> (i32, i32) {
    %c0_i32 = arith.constant 0 : i32
    %c0_i32_0 = arith.constant 0 : i32
    %c0_i32_1 = arith.constant 0 : i32
    return %c0_i32, %c0_i32_0 : i32, i32
  }
  func.func @transform_4(%arg0: i32) -> (i32, i32) {
    %c0_i32 = arith.constant 0 : i32
    %c0_i32_0 = arith.constant 0 : i32
    %c0_i32_1 = arith.constant 0 : i32
    return %c0_i32, %c0_i32_0 : i32, i32
  }
  func.func @transform_5(%arg0: i32) -> (i32, i32) {
    %c0_i32 = arith.constant 0 : i32
    %c0_i32_0 = arith.constant 0 : i32
    %c0_i32_1 = arith.constant 0 : i32
    return %c0_i32, %c0_i32_0 : i32, i32
  }
  func.func @transform_6(%arg0: i32) -> (i32, i32) {
    %c0_i32 = arith.constant 0 : i32
    %c0_i32_0 = arith.constant 0 : i32
    %c0_i32_1 = arith.constant 0 : i32
    return %c0_i32, %c0_i32_0 : i32, i32
  }
  func.func @transform_7(%arg0: i32) -> (i32, i32) {
    %c0_i32 = arith.constant 0 : i32
    %c0_i32_0 = arith.constant 0 : i32
    %c0_i32_1 = arith.constant 0 : i32
    return %c0_i32, %c0_i32_0 : i32, i32
  }
  func.func @transform_8(%arg0: i32) -> (i32, i32) {
    %c0_i32 = arith.constant 0 : i32
    %c0_i32_0 = arith.constant 0 : i32
    %c0_i32_1 = arith.constant 0 : i32
    return %c0_i32, %c0_i32_0 : i32, i32
  }
  func.func @transform_9(%arg0: i32) -> (i32, i32) {
    %c0_i32 = arith.constant 0 : i32
    %c0_i32_0 = arith.constant 0 : i32
    %c0_i32_1 = arith.constant 0 : i32
    return %c0_i32, %c0_i32_0 : i32, i32
  }
  func.func @transform_10(%arg0: i32) -> (i32, i32) {
    %c0_i32 = arith.constant 0 : i32
    %c0_i32_0 = arith.constant 0 : i32
    %c0_i32_1 = arith.constant 0 : i32
    return %c0_i32, %c0_i32_0 : i32, i32
  }
  func.func @transform_11(%arg0: i32) -> (i32, i32) {
    %c0_i32 = arith.constant 0 : i32
    %c0_i32_0 = arith.constant 0 : i32
    %c0_i32_1 = arith.constant 0 : i32
    return %c0_i32, %c0_i32_0 : i32, i32
  }
  func.func @transform_12(%arg0: i32) -> (i32, i32) {
    %c0_i32 = arith.constant 0 : i32
    %c0_i32_0 = arith.constant 0 : i32
    %c0_i32_1 = arith.constant 0 : i32
    return %c0_i32, %c0_i32_0 : i32, i32
  }
  func.func @transform_13(%arg0: i32) -> (i32, i32) {
    %c0_i32 = arith.constant 0 : i32
    %c0_i32_0 = arith.constant 0 : i32
    %c0_i32_1 = arith.constant 0 : i32
    return %c0_i32, %c0_i32_0 : i32, i32
  }
  func.func @transform_14(%arg0: i32) -> (i32, i32) {
    %c0_i32 = arith.constant 0 : i32
    %c0_i32_0 = arith.constant 0 : i32
    %c0_i32_1 = arith.constant 0 : i32
    return %c0_i32, %c0_i32_0 : i32, i32
  }
  func.func @transform_15(%arg0: i32) -> (i32, i32) {
    %c0_i32 = arith.constant 0 : i32
    %c0_i32_0 = arith.constant 0 : i32
    %c0_i32_1 = arith.constant 0 : i32
    return %c0_i32, %c0_i32_0 : i32, i32
  }
  func.func @transform_16(%arg0: i32) -> (i32, i32) {
    %c0_i32 = arith.constant 0 : i32
    %c0_i32_0 = arith.constant 0 : i32
    %c0_i32_1 = arith.constant 0 : i32
    return %c0_i32, %c0_i32_0 : i32, i32
  }
  func.func @transform_17(%arg0: i32) -> (i32, i32) {
    %c0_i32 = arith.constant 0 : i32
    %c0_i32_0 = arith.constant 0 : i32
    %c0_i32_1 = arith.constant 0 : i32
    return %c0_i32, %c0_i32_0 : i32, i32
  }
  func.func @transform_18(%arg0: i32) -> (i32, i32) {
    %c0_i32 = arith.constant 0 : i32
    %c0_i32_0 = arith.constant 0 : i32
    %c0_i32_1 = arith.constant 0 : i32
    return %c0_i32, %c0_i32_0 : i32, i32
  }
  func.func @transform_19(%arg0: i32) -> (i32, i32) {
    %c0_i32 = arith.constant 0 : i32
    %c0_i32_0 = arith.constant 0 : i32
    %c0_i32_1 = arith.constant 0 : i32
    return %c0_i32, %c0_i32_0 : i32, i32
  }
  func.func @transform_20(%arg0: i32) -> (i32, i32) {
    %c0_i32 = arith.constant 0 : i32
    %c0_i32_0 = arith.constant 0 : i32
    %c0_i32_1 = arith.constant 0 : i32
    return %c0_i32, %c0_i32_0 : i32, i32
  }
  func.func @transform_21(%arg0: i32) -> (i32, i32) {
    %c0_i32 = arith.constant 0 : i32
    %c0_i32_0 = arith.constant 0 : i32
    %c0_i32_1 = arith.constant 0 : i32
    return %c0_i32, %c0_i32_0 : i32, i32
  }
  func.func @transform_22(%arg0: i32) -> (i32, i32) {
    %c0_i32 = arith.constant 0 : i32
    %c0_i32_0 = arith.constant 0 : i32
    %c0_i32_1 = arith.constant 0 : i32
    return %c0_i32, %c0_i32_0 : i32, i32
  }
  func.func @transform_23(%arg0: i32) -> (i32, i32) {
    %c0_i32 = arith.constant 0 : i32
    %c0_i32_0 = arith.constant 0 : i32
    %c0_i32_1 = arith.constant 0 : i32
    return %c0_i32, %c0_i32_0 : i32, i32
  }
  func.func @transform_24(%arg0: i32) -> (i32, i32) {
    %c0_i32 = arith.constant 0 : i32
    %c0_i32_0 = arith.constant 0 : i32
    %c0_i32_1 = arith.constant 0 : i32
    return %c0_i32, %c0_i32_0 : i32, i32
  }
  func.func @transform_25(%arg0: i32) -> (i32, i32) {
    %c0_i32 = arith.constant 0 : i32
    %c0_i32_0 = arith.constant 0 : i32
    %c0_i32_1 = arith.constant 0 : i32
    return %c0_i32, %c0_i32_0 : i32, i32
  }
  func.func @transform_26(%arg0: i32) -> (i32, i32) {
    %c0_i32 = arith.constant 0 : i32
    %c0_i32_0 = arith.constant 0 : i32
    %c0_i32_1 = arith.constant 0 : i32
    return %c0_i32, %c0_i32_0 : i32, i32
  }
}

</mosaic_0001>

<bundles_post_ra>
// kernel: model_gmc_forward.1
= control target key start
LH: loop header
LB: loop body
LE: loop exit
PB: predicated region body
PF: predicated region fallthrough
CT: control target
= control target key end

     0   :  { %s4120_s0 = inlined_call_operand.vmem [shape: bf16[64,16], index: 0, kind: input, shape index: {}]   ;;  %s4121_s1 = inlined_call_operand.vmem [shape: s32[1,32], index: 1, kind: input, shape index: {}]   ;;  %s4122_s2 = inlined_call_operand.hbm [shape: f32[2,32], index: 2, kind: input, shape index: {}]   ;;  %s4123_s3 = inlined_call_operand.hbm [shape: f32[2,16], index: 3, kind: input, shape index: {}]   ;;  %s4124_s4 = inlined_call_operand.hbm [shape: bf16[16,64], index: 4, kind: input, shape index: {}]   ;;  %s4125_s5 = inlined_call_operand.vmem [shape: bf16[64,64], index: 5, kind: input, shape index: {}]   ;;  %s4126_s6 = inlined_call_operand.hbm [shape: bf16[64,128], index: 6, kind: input, shape index: {}]   ;;  %s4127_s7 = inlined_call_operand.vmem [shape: bf16[128,128], index: 7, kind: input, shape index: {}]   ;;  %s4128_s8 = inlined_call_operand.hbm [shape: bf16[128,128], index: 8, kind: input, shape index: {}]   ;;  %s4129_s9 = inlined_call_operand.hbm [shape: f32[1,128], index: 9, kind: input, shape index: {}]   ;;  %s4130_s10 = inlined_call_operand.hbm [shape: bf16[32,128], index: 10, kind: input, shape index: {}]   ;;  %s4131_s11 = inlined_call_operand.hbm [shape: f32[1,128], index: 11, kind: input, shape index: {}]   ;;  %s4132_s12 = inlined_call_operand.hbm [shape: bf16[16,128], index: 12, kind: input, shape index: {}]   ;;  %s4133_s13 = inlined_call_operand.hbm [shape: f32[1,128], index: 13, kind: input, shape index: {}]   ;;  %s4134_s14 = inlined_call_operand.vmem [shape: bf16[256,128], index: 14, kind: input, shape index: {}]   ;;  %s4135_s15 = inlined_call_operand.hbm [shape: f32[1,128], index: 15, kind: input, shape index: {}]   ;;  %s4136_s16 = inlined_call_operand.vmem [shape: bf16[384,128], index: 16, kind: input, shape index: {}]   ;;  %s4137_s17 = inlined_call_operand.hbm [shape: f32[1,128], index: 17, kind: input, shape index: {}]   ;;  %s4138_s18 = inlined_call_operand.vmem [shape: bf16[128,128], index: 18, kind: input, shape index: {}]   ;;  %s4139_s19 = inlined_call_operand.hbm [shape: f32[1,128], index: 19, kind: input, shape index: {}]   ;;  %s4140_s20 = inlined_call_operand.hbm [shape: bf16[128,128], index: 20, kind: input, shape index: {}]   ;;  %s4141_s21 = inlined_call_operand.hbm [shape: f32[1,128], index: 21, kind: input, shape index: {}]   ;;  %s4142_s22 = inlined_call_operand.hbm [shape: bf16[128,128], index: 22, kind: input, shape index: {}]   ;;  %s4143_s23 = inlined_call_operand.hbm [shape: f32[1,128], index: 23, kind: input, shape index: {}]   ;;  %s4144_s24 = inlined_call_operand.hbm [shape: bf16[128,128], index: 24, kind: input, shape index: {}]   ;;  %s4145_s25 = inlined_call_operand.hbm [shape: f32[1,128], index: 25, kind: input, shape index: {}]   ;;  %s4146_s26 = inlined_call_operand.hbm [shape: f32[2,128], index: 26, kind: output, shape index: {}]  }
   0x1   :  { %4159 = sst [smem:[#allocation44_spill]] %s4120_s0 }
   0x2   :  { %4160 = sst [smem:[#allocation45_spill]] %s4121_s1 }
   0x3   :  { %4161 = sst [smem:[#allocation46_spill]] %s4122_s2 }
   0x4   :  { %4162 = sst [smem:[#allocation47_spill]] %s4123_s3 }
   0x5   :  { %4163 = sst [smem:[#allocation48_spill]] %s4124_s4 }
   0x6   :  { %4164 = sst [smem:[#allocation49_spill]] %s4125_s5 }
   0x7   :  { %4165 = sst [smem:[#allocation50_spill]] %s4126_s6 }
   0x8   :  { %4166 = sst [smem:[#allocation51_spill]] %s4127_s7 }
   0x9   :  { %4167 = sst [smem:[#allocation52_spill]] %s4128_s8 }
   0xa   :  { %4168 = sst [smem:[#allocation53_spill]] %s4129_s9 }
   0xb   :  { %4169 = sst [smem:[#allocation54_spill]] %s4130_s10 }
   0xc   :  { %4170 = sst [smem:[#allocation55_spill]] %s4138_s18 }
   0xd   :  { %4171 = sst [smem:[#allocation56_spill]] %s4146_s26 }
   0xe   :  { %31 = vsyncpa [#allocation3], 0 }
   0xf   :  { %32 = vsyncpa [#allocation6], 0 }
  0x10   :  { %33 = vsyncpa [#allocation9], 0 }
  0x11   :  { %34 = vsyncpa [#allocation12], 0 }
  0x12   :  { %35 = vsyncpa [#allocation15], 0 }
  0x13   :  { %36 = vsyncpa [#allocation18], 0 }
  0x14   :  { %37 = vsyncpa [#allocation21], 0 }
  0x15   :  { %38 = vsyncpa [#allocation24], 0 }
  0x16   :  { %39 = vsyncpa [#allocation27], 0 }
  0x17   :  { %40 = vsyncpa [#allocation30], 0 }
  0x18   :  { %41 = vsyncpa [#allocation4], 0  ;;  %s3356_s27 = smov [#allocation5]   ;;  %s4172_s8 = sld [smem:[#allocation47_spill]] }
  0x19   :  { %s62_s3 = sshll.u32 %s3356_s27, 4  ;;  %s63_s3 = int_to_ptr.vmem [resolvable:$true] %s62_s3 }
  0x1e   :  { %s2894_s4 = scalar_lea.hbm %s4172_s8, 32 }
  0x1f   :  { %p2895_p0 = scmp.ne.s32.totalorder %s4172_s8, %s2894_s4  ;;  %p2898_p1 = scmp.lt.u32.totalorder %s2894_s4, %s4172_s8 }
  0x21   :  { %p2900_p2 = pnand %p2898_p1, %p2895_p0 }
  0x23   :  { %2903 = shalt.err (!%p2900_p2)
}
  0x24   :  { %s2904_s2 = scalar_lea.vmem %s63_s3, 32  ;;  %p2909_p4 = scmp.lt.s32.totalorder %s63_s3, %s63_s3 }
  0x25   :  { %p2905_p3 = scmp.ne.s32.totalorder %s63_s3, %s2904_s2  ;;  %p2910_p5 = scmp.lt.s32.totalorder %s2904_s2, %s2904_s2 }
  0x27   :  { %p2911_p6 = por %p2910_p5, %p2909_p4 }
  0x29   :  { %p2912_p7 = pnand %p2911_p6, %p2905_p3 }
  0x2b   :  { %2915 = shalt.err (!%p2912_p7)
}
  0x2c   :  { %65 = dma.hbm_to_vmem [thread:$0]  %s4172_s8, 32, %s63_s3, [#allocation6]  }
  0x2d   :  { %s3357_s6 = smov [#allocation8]   ;;  %s3358_s27 = smov [#allocation11]  }
  0x2e   :  { %s85_s1 = sshll.u32 %s3357_s6, 4  ;;  %s112_s7 = sshll.u32 %s3358_s27, 4  ;;  %s86_s1 = int_to_ptr.vmem [resolvable:$true] %s85_s1  ;;  %s113_s7 = int_to_ptr.vmem [resolvable:$true] %s112_s7 }
  0x2f   :  { %s4173_s29 = sld [smem:[#allocation50_spill]] }
  0x35   :  { %s2916_s0 = scalar_lea.hbm %s4173_s29, 512 }
  0x36   :  { %p2917_p8 = scmp.ne.s32.totalorder %s4173_s29, %s2916_s0  ;;  %p2920_p9 = scmp.lt.u32.totalorder %s2916_s0, %s4173_s29 }
  0x38   :  { %p2922_p10 = pnand %p2920_p9, %p2917_p8 }
  0x3a   :  { %2925 = shalt.err (!%p2922_p10)
}
  0x3b   :  { %s2926_s3 = scalar_lea.vmem %s86_s1, 512  ;;  %p2931_p12 = scmp.lt.s32.totalorder %s86_s1, %s86_s1 }
  0x3c   :  { %p2927_p11 = scmp.ne.s32.totalorder %s86_s1, %s2926_s3  ;;  %p2932_p13 = scmp.lt.s32.totalorder %s2926_s3, %s2926_s3 }
  0x3e   :  { %p2933_p0 = por %p2932_p13, %p2931_p12 }
  0x40   :  { %p2934_p1 = pnand %p2933_p0, %p2927_p11 }
  0x42   :  { %2937 = shalt.err (!%p2934_p1)
}
  0x43   :  { %s3359_s8 = smov 64   ;;  %s3360_s5 = smov 4  }
  0x44   :  { %91 = dma.hbm_to_vmem [thread:$0]  %s4173_s29, 512, %s86_s1, [#allocation9], %s3359_s8, %s3359_s8, %s3360_s5  }
  0x45   :  { %s4174_s28 = sld [smem:[#allocation53_spill]] }
  0x4b   :  { %s2938_s4 = scalar_lea.hbm %s4174_s28, 16 }
  0x4c   :  { %p2939_p2 = scmp.ne.s32.totalorder %s4174_s28, %s2938_s4  ;;  %p2942_p3 = scmp.lt.u32.totalorder %s2938_s4, %s4174_s28 }
  0x4e   :  { %p2944_p4 = pnand %p2942_p3, %p2939_p2 }
  0x50   :  { %2947 = shalt.err (!%p2944_p4)
}
  0x51   :  { %s2948_s3 = scalar_lea.vmem %s113_s7, 16  ;;  %s2952_s18 = scalar_lea.vmem %s113_s7, 32 }
  0x52   :  { %p2949_p5 = scmp.ne.s32.totalorder %s113_s7, %s2948_s3  ;;  %p2953_p6 = scmp.lt.s32.totalorder %s113_s7, %s113_s7 }
  0x53   :  { %p2954_p7 = scmp.lt.s32.totalorder %s2952_s18, %s2948_s3 }
  0x55   :  { %p2955_p8 = por %p2954_p7, %p2953_p6 }
  0x57   :  { %p2956_p9 = pnand %p2955_p8, %p2949_p5 }
  0x59   :  { %2959 = shalt.err (!%p2956_p9)
}
  0x5a   :  { %115 = dma.hbm_to_vmem [thread:$0]  %s4174_s28, 16, %s113_s7, [#allocation12]  }
  0x5b   :  { %s3361_s10 = smov [#allocation14]   ;;  %s3362_s26 = smov [#allocation17]  }
  0x5c   :  { %s134_s6 = sshll.u32 %s3361_s10, 4  ;;  %s156_s27 = sshll.u32 %s3362_s26, 4  ;;  %s135_s6 = int_to_ptr.vmem [resolvable:$true] %s134_s6  ;;  %s157_s27 = int_to_ptr.vmem [resolvable:$true] %s156_s27 }
  0x5d   :  { %s2960_s9 = scalar_lea.hbm %s4131_s11, 16 }
  0x5e   :  { %p2961_p10 = scmp.ne.s32.totalorder %s4131_s11, %s2960_s9  ;;  %p2964_p11 = scmp.lt.u32.totalorder %s2960_s9, %s4131_s11 }
  0x60   :  { %p2966_p12 = pnand %p2964_p11, %p2961_p10 }
  0x62   :  { %2969 = shalt.err (!%p2966_p12)
}
  0x63   :  { %s2970_s7 = scalar_lea.vmem %s135_s6, 16  ;;  %s2974_s28 = scalar_lea.vmem %s135_s6, 32 }
  0x64   :  { %p2971_p13 = scmp.ne.s32.totalorder %s135_s6, %s2970_s7  ;;  %p2975_p0 = scmp.lt.s32.totalorder %s135_s6, %s135_s6 }
  0x65   :  { %p2976_p1 = scmp.lt.s32.totalorder %s2974_s28, %s2970_s7 }
  0x67   :  { %p2977_p2 = por %p2976_p1, %p2975_p0 }
  0x69   :  { %p2978_p3 = pnand %p2977_p2, %p2971_p13 }
  0x6b   :  { %2981 = shalt.err (!%p2978_p3)
}
  0x6c   :  { %137 = dma.hbm_to_vmem [thread:$0]  %s4131_s11, 16, %s135_s6, [#allocation15]  }
  0x6d   :  { %s2982_s4 = scalar_lea.hbm %s4133_s13, 16 }
  0x6e   :  { %p2983_p4 = scmp.ne.s32.totalorder %s4133_s13, %s2982_s4  ;;  %p2986_p5 = scmp.lt.u32.totalorder %s2982_s4, %s4133_s13 }
  0x70   :  { %p2988_p6 = pnand %p2986_p5, %p2983_p4 }
  0x72   :  { %2991 = shalt.err (!%p2988_p6)
}
  0x73   :  { %s2992_s18 = scalar_lea.vmem %s157_s27, 16  ;;  %s2996_s3 = scalar_lea.vmem %s157_s27, 32 }
  0x74   :  { %p2993_p7 = scmp.ne.s32.totalorder %s157_s27, %s2992_s18  ;;  %p2997_p8 = scmp.lt.s32.totalorder %s157_s27, %s157_s27 }
  0x75   :  { %p2998_p9 = scmp.lt.s32.totalorder %s2996_s3, %s2992_s18 }
  0x77   :  { %p2999_p10 = por %p2998_p9, %p2997_p8 }
  0x79   :  { %p3000_p11 = pnand %p2999_p10, %p2993_p7 }
  0x7b   :  { %3003 = shalt.err (!%p3000_p11)
}
  0x7c   :  { %159 = dma.hbm_to_vmem [thread:$0]  %s4133_s13, 16, %s157_s27, [#allocation18]  }
  0x7d   :  { %s3363_s7 = smov [#allocation20]   ;;  %s3364_s1 = smov [#allocation23]  }
  0x7e   :  { %s180_s28 = sshll.u32 %s3363_s7, 4  ;;  %s201_s29 = sshll.u32 %s3364_s1, 4  ;;  %s181_s28 = int_to_ptr.vmem [resolvable:$true] %s180_s28  ;;  %s202_s29 = int_to_ptr.vmem [resolvable:$true] %s201_s29 }
  0x7f   :  { %s3004_s4 = scalar_lea.hbm %s4137_s17, 16 }
  0x80   :  { %p3005_p12 = scmp.ne.s32.totalorder %s4137_s17, %s3004_s4  ;;  %p3008_p13 = scmp.lt.u32.totalorder %s3004_s4, %s4137_s17 }
  0x82   :  { %p3010_p0 = pnand %p3008_p13, %p3005_p12 }
  0x84   :  { %3013 = shalt.err (!%p3010_p0)
}
  0x85   :  { %s3014_s13 = scalar_lea.vmem %s181_s28, 16  ;;  %s3018_s27 = scalar_lea.vmem %s181_s28, 32 }
  0x86   :  { %p3015_p1 = scmp.ne.s32.totalorder %s181_s28, %s3014_s13  ;;  %p3019_p2 = scmp.lt.s32.totalorder %s181_s28, %s181_s28 }
  0x87   :  { %p3020_p3 = scmp.lt.s32.totalorder %s3018_s27, %s3014_s13 }
  0x89   :  { %p3021_p4 = por %p3020_p3, %p3019_p2 }
  0x8b   :  { %p3022_p5 = pnand %p3021_p4, %p3015_p1 }
  0x8d   :  { %3025 = shalt.err (!%p3022_p5)
}
  0x8e   :  { %183 = dma.hbm_to_vmem [thread:$0]  %s4137_s17, 16, %s181_s28, [#allocation21]  }
  0x8f   :  { %s3026_s7 = scalar_lea.hbm %s4140_s20, 1024 }
  0x90   :  { %p3027_p6 = scmp.ne.s32.totalorder %s4140_s20, %s3026_s7  ;;  %p3030_p7 = scmp.lt.u32.totalorder %s3026_s7, %s4140_s20 }
  0x92   :  { %p3032_p8 = pnand %p3030_p7, %p3027_p6 }
  0x94   :  { %3035 = shalt.err (!%p3032_p8)
}
  0x95   :  { %s3036_s0 = scalar_lea.vmem %s202_s29, 1024  ;;  %p3041_p10 = scmp.lt.s32.totalorder %s202_s29, %s202_s29 }
  0x96   :  { %p3037_p9 = scmp.ne.s32.totalorder %s202_s29, %s3036_s0  ;;  %p3042_p11 = scmp.lt.s32.totalorder %s3036_s0, %s3036_s0 }
  0x98   :  { %p3043_p12 = por %p3042_p11, %p3041_p10 }
  0x9a   :  { %p3044_p13 = pnand %p3043_p12, %p3037_p9 }
  0x9c   :  { %3047 = shalt.err (!%p3044_p13)
}
  0x9d   :  { %207 = dma.hbm_to_vmem [thread:$0]  %s4140_s20, 1024, %s202_s29, [#allocation24], %s3359_s8, %s3359_s8, %s3360_s5  }
  0x9e   :  { %s3365_s9 = smov [#allocation26]   ;;  %s3366_s2 = smov [#allocation29]  }
  0x9f   :  { %s223_s30 = sshll.u32 %s3365_s9, 4  ;;  %s245_s13 = sshll.u32 %s3366_s2, 4  ;;  %s224_s30 = int_to_ptr.vmem [resolvable:$true] %s223_s30  ;;  %s246_s13 = int_to_ptr.vmem [resolvable:$true] %s245_s13 }
  0xa0   :  { %s3048_s3 = scalar_lea.hbm %s4142_s22, 1024 }
  0xa1   :  { %p3049_p0 = scmp.ne.s32.totalorder %s4142_s22, %s3048_s3  ;;  %p3052_p1 = scmp.lt.u32.totalorder %s3048_s3, %s4142_s22 }
  0xa3   :  { %p3054_p2 = pnand %p3052_p1, %p3049_p0 }
  0xa5   :  { %3057 = shalt.err (!%p3054_p2)
}
  0xa6   :  { %s3058_s20 = scalar_lea.vmem %s224_s30, 1024  ;;  %p3063_p4 = scmp.lt.s32.totalorder %s224_s30, %s224_s30 }
  0xa7   :  { %p3059_p3 = scmp.ne.s32.totalorder %s224_s30, %s3058_s20  ;;  %p3064_p5 = scmp.lt.s32.totalorder %s3058_s20, %s3058_s20 }
  0xa9   :  { %p3065_p6 = por %p3064_p5, %p3063_p4 }
  0xab   :  { %p3066_p7 = pnand %p3065_p6, %p3059_p3 }
  0xad   :  { %3069 = shalt.err (!%p3066_p7)
}
  0xae   :  { %229 = dma.hbm_to_vmem [thread:$0]  %s4142_s22, 1024, %s224_s30, [#allocation27], %s3359_s8, %s3359_s8, %s3360_s5  }
  0xaf   :  { %s3070_s0 = scalar_lea.hbm %s4144_s24, 1024 }
  0xb0   :  { %p3071_p8 = scmp.ne.s32.totalorder %s4144_s24, %s3070_s0  ;;  %p3074_p9 = scmp.lt.u32.totalorder %s3070_s0, %s4144_s24 }
  0xb2   :  { %p3076_p10 = pnand %p3074_p9, %p3071_p8 }
  0xb4   :  { %3079 = shalt.err (!%p3076_p10)
}
  0xb5   :  { %s3080_s27 = scalar_lea.vmem %s246_s13, 1024  ;;  %p3085_p12 = scmp.lt.s32.totalorder %s246_s13, %s246_s13 }
  0xb6   :  { %p3081_p11 = scmp.ne.s32.totalorder %s246_s13, %s3080_s27  ;;  %p3086_p13 = scmp.lt.s32.totalorder %s3080_s27, %s3080_s27 }
  0xb8   :  { %p3087_p0 = por %p3086_p13, %p3085_p12 }
  0xba   :  { %p3088_p1 = pnand %p3087_p0, %p3081_p11 }
  0xbc   :  { %3091 = shalt.err (!%p3088_p1)
}
  0xbd   :  { %251 = dma.hbm_to_vmem [thread:$0]  %s4144_s24, 1024, %s246_s13, [#allocation30], %s3359_s8, %s3359_s8, %s3360_s5  }
  0xbe   :  { %s3367_s18 = smov [#allocation2]   ;;  %s3368_s11 = smov [#allocation7]  }
  0xbf   :  { %s52_s3 = sshll.u32 %s3367_s18, 4  ;;  %s71_s6 = sshll.u32 %s3368_s11, 4  ;;  %s53_s3 = int_to_ptr.vmem [resolvable:$true] %s52_s3  ;;  %s72_s6 = int_to_ptr.vmem [resolvable:$true] %s71_s6 }
  0xc0   :  { %s4175_s20 = sld [smem:[#allocation46_spill]] }
  0xc6   :  { %s3092_s29 = scalar_lea.hbm %s4175_s20, 32 }
  0xc7   :  { %p3093_p2 = scmp.ne.s32.totalorder %s4175_s20, %s3092_s29  ;;  %p3096_p3 = scmp.lt.u32.totalorder %s3092_s29, %s4175_s20 }
  0xc9   :  { %p3098_p4 = pnand %p3096_p3, %p3093_p2 }
  0xcb   :  { %3101 = shalt.err (!%p3098_p4)
}
  0xcc   :  { %s3102_s24 = scalar_lea.vmem %s53_s3, 32  ;;  %p3107_p6 = scmp.lt.s32.totalorder %s53_s3, %s53_s3 }
  0xcd   :  { %p3103_p5 = scmp.ne.s32.totalorder %s53_s3, %s3102_s24  ;;  %p3108_p7 = scmp.lt.s32.totalorder %s3102_s24, %s3102_s24 }
  0xcf   :  { %p3109_p8 = por %p3108_p7, %p3107_p6 }
  0xd1   :  { %p3110_p9 = pnand %p3109_p8, %p3103_p5 }
  0xd3   :  { %3113 = shalt.err (!%p3110_p9)
}
  0xd4   :  { %55 = dma.hbm_to_vmem [thread:$0]  %s4175_s20, 32, %s53_s3, [#allocation3]  }
  0xd5   :  { %s4176_s2 = sld [smem:[#allocation48_spill]] }
  0xdb   :  { %s3114_s27 = scalar_lea.hbm %s4176_s2, 128 }
  0xdc   :  { %p3115_p10 = scmp.ne.s32.totalorder %s4176_s2, %s3114_s27  ;;  %p3118_p11 = scmp.lt.u32.totalorder %s3114_s27, %s4176_s2 }
  0xde   :  { %p3120_p12 = pnand %p3118_p11, %p3115_p10 }
  0xe0   :  { %3123 = shalt.err (!%p3120_p12)
}
  0xe1   :  { %s3124_s7 = scalar_lea.vmem %s72_s6, 128  ;;  %p3129_p0 = scmp.lt.s32.totalorder %s72_s6, %s72_s6 }
  0xe2   :  { %p3125_p13 = scmp.ne.s32.totalorder %s72_s6, %s3124_s7  ;;  %p3130_p1 = scmp.lt.s32.totalorder %s3124_s7, %s3124_s7 }
  0xe4   :  { %p3131_p2 = por %p3130_p1, %p3129_p0 }
  0xe6   :  { %p3132_p3 = pnand %p3131_p2, %p3125_p13 }
  0xe8   :  { %3135 = shalt.err (!%p3132_p3)
}
  0xe9   :  { %77 = dma.hbm_to_vmem [thread:$0]  %s4176_s2, 128, %s72_s6, [#allocation6], %s3359_s8, %s3359_s8, %s3360_s5  }
  0xea   :  { %s3369_s20 = smov [#allocation10]   ;;  %s3370_s10 = smov [#allocation13]  }
  0xeb   :  { %s99_s29 = sshll.u32 %s3369_s20, 4  ;;  %s121_s26 = sshll.u32 %s3370_s10, 4  ;;  %s100_s29 = int_to_ptr.vmem [resolvable:$true] %s99_s29  ;;  %s122_s26 = int_to_ptr.vmem [resolvable:$true] %s121_s26 }
  0xec   :  { %s4177_s24 = sld [smem:[#allocation52_spill]] }
  0xf2   :  { %s3136_s13 = scalar_lea.hbm %s4177_s24, 1024 }
  0xf3   :  { %p3137_p4 = scmp.ne.s32.totalorder %s4177_s24, %s3136_s13  ;;  %p3140_p5 = scmp.lt.u32.totalorder %s3136_s13, %s4177_s24 }
  0xf5   :  { %p3142_p6 = pnand %p3140_p5, %p3137_p4 }
  0xf7   :  { %3145 = shalt.err (!%p3142_p6)
}
  0xf8   :  { %s3146_s6 = scalar_lea.vmem %s100_s29, 1024  ;;  %p3151_p8 = scmp.lt.s32.totalorder %s100_s29, %s100_s29 }
  0xf9   :  { %p3147_p7 = scmp.ne.s32.totalorder %s100_s29, %s3146_s6  ;;  %p3152_p9 = scmp.lt.s32.totalorder %s3146_s6, %s3146_s6 }
  0xfb   :  { %p3153_p10 = por %p3152_p9, %p3151_p8 }
  0xfd   :  { %p3154_p11 = pnand %p3153_p10, %p3147_p7 }
  0xff   :  { %3157 = shalt.err (!%p3154_p11)
}
 0x100   :  { %105 = dma.hbm_to_vmem [thread:$0]  %s4177_s24, 1024, %s100_s29, [#allocation9], %s3359_s8, %s3359_s8, %s3360_s5  }
 0x101   :  { %s4178_s11 = sld [smem:[#allocation54_spill]] }
 0x107   :  { %s3158_s7 = scalar_lea.hbm %s4178_s11, 256 }
 0x108   :  { %p3159_p12 = scmp.ne.s32.totalorder %s4178_s11, %s3158_s7  ;;  %p3162_p13 = scmp.lt.u32.totalorder %s3158_s7, %s4178_s11 }
 0x10a   :  { %p3164_p0 = pnand %p3162_p13, %p3159_p12 }
 0x10c   :  { %3167 = shalt.err (!%p3164_p0)
}
 0x10d   :  { %s3168_s4 = scalar_lea.vmem %s122_s26, 256  ;;  %p3173_p2 = scmp.lt.s32.totalorder %s122_s26, %s122_s26 }
 0x10e   :  { %p3169_p1 = scmp.ne.s32.totalorder %s122_s26, %s3168_s4  ;;  %p3174_p3 = scmp.lt.s32.totalorder %s3168_s4, %s3168_s4 }
 0x110   :  { %p3175_p4 = por %p3174_p3, %p3173_p2 }
 0x112   :  { %p3176_p5 = pnand %p3175_p4, %p3169_p1 }
 0x114   :  { %3179 = shalt.err (!%p3176_p5)
}
 0x115   :  { %127 = dma.hbm_to_vmem [thread:$0]  %s4178_s11, 256, %s122_s26, [#allocation12], %s3359_s8, %s3359_s8, %s3360_s5  }
 0x116   :  { %s3371_s24 = smov [#allocation16]   ;;  %s3372_s17 = smov [#allocation19]  }
 0x117   :  { %s143_s13 = sshll.u32 %s3371_s24, 4  ;;  %s168_s28 = sshll.u32 %s3372_s17, 4  ;;  %s144_s13 = int_to_ptr.vmem [resolvable:$true] %s143_s13  ;;  %s169_s28 = int_to_ptr.vmem [resolvable:$true] %s168_s28 }
 0x118   :  { %s3180_s6 = scalar_lea.hbm %s4132_s12, 128 }
 0x119   :  { %p3181_p6 = scmp.ne.s32.totalorder %s4132_s12, %s3180_s6  ;;  %p3184_p7 = scmp.lt.u32.totalorder %s3180_s6, %s4132_s12 }
 0x11b   :  { %p3186_p8 = pnand %p3184_p7, %p3181_p6 }
 0x11d   :  { %3189 = shalt.err (!%p3186_p8)
}
 0x11e   :  { %s3190_s26 = scalar_lea.vmem %s144_s13, 128  ;;  %p3195_p10 = scmp.lt.s32.totalorder %s144_s13, %s144_s13 }
 0x11f   :  { %p3191_p9 = scmp.ne.s32.totalorder %s144_s13, %s3190_s26  ;;  %p3196_p11 = scmp.lt.s32.totalorder %s3190_s26, %s3190_s26 }
 0x121   :  { %p3197_p12 = por %p3196_p11, %p3195_p10 }
 0x123   :  { %p3198_p13 = pnand %p3197_p12, %p3191_p9 }
 0x125   :  { %3201 = shalt.err (!%p3198_p13)
}
 0x126   :  { %149 = dma.hbm_to_vmem [thread:$0]  %s4132_s12, 128, %s144_s13, [#allocation15], %s3359_s8, %s3359_s8, %s3360_s5  }
 0x127   :  { %s3202_s20 = scalar_lea.hbm %s4135_s15, 16 }
 0x128   :  { %p3203_p0 = scmp.ne.s32.totalorder %s4135_s15, %s3202_s20  ;;  %p3206_p1 = scmp.lt.u32.totalorder %s3202_s20, %s4135_s15 }
 0x12a   :  { %p3208_p2 = pnand %p3206_p1, %p3203_p0 }
 0x12c   :  { %3211 = shalt.err (!%p3208_p2)
}
 0x12d   :  { %s3212_s24 = scalar_lea.vmem %s169_s28, 16  ;;  %s3216_s17 = scalar_lea.vmem %s169_s28, 32 }
 0x12e   :  { %p3213_p3 = scmp.ne.s32.totalorder %s169_s28, %s3212_s24  ;;  %p3217_p4 = scmp.lt.s32.totalorder %s169_s28, %s169_s28 }
 0x12f   :  { %p3218_p5 = scmp.lt.s32.totalorder %s3216_s17, %s3212_s24 }
 0x131   :  { %p3219_p6 = por %p3218_p5, %p3217_p4 }
 0x133   :  { %p3220_p7 = pnand %p3219_p6, %p3213_p3 }
 0x135   :  { %3223 = shalt.err (!%p3220_p7)
}
 0x136   :  { %171 = dma.hbm_to_vmem [thread:$0]  %s4135_s15, 16, %s169_s28, [#allocation18]  }
 0x137   :  { %s3373_s5 = smov [#allocation22]   ;;  %s3374_s9 = smov [#allocation25]  }
 0x138   :  { %s192_s13 = sshll.u32 %s3373_s5, 4  ;;  %s214_s27 = sshll.u32 %s3374_s9, 4  ;;  %s193_s13 = int_to_ptr.vmem [resolvable:$true] %s192_s13  ;;  %s215_s27 = int_to_ptr.vmem [resolvable:$true] %s214_s27 }
 0x139   :  { %s3224_s22 = scalar_lea.hbm %s4139_s19, 16 }
 0x13a   :  { %p3225_p8 = scmp.ne.s32.totalorder %s4139_s19, %s3224_s22  ;;  %p3228_p9 = scmp.lt.u32.totalorder %s3224_s22, %s4139_s19 }
 0x13c   :  { %p3230_p10 = pnand %p3228_p9, %p3225_p8 }
 0x13e   :  { %3233 = shalt.err (!%p3230_p10)
}
 0x13f   :  { %s3234_s15 = scalar_lea.vmem %s193_s13, 16  ;;  %s3238_s28 = scalar_lea.vmem %s193_s13, 32 }
 0x140   :  { %p3235_p11 = scmp.ne.s32.totalorder %s193_s13, %s3234_s15  ;;  %p3239_p12 = scmp.lt.s32.totalorder %s193_s13, %s193_s13 }
 0x141   :  { %p3240_p13 = scmp.lt.s32.totalorder %s3238_s28, %s3234_s15 }
 0x143   :  { %p3241_p0 = por %p3240_p13, %p3239_p12 }
 0x145   :  { %p3242_p1 = pnand %p3241_p0, %p3235_p11 }
 0x147   :  { %3245 = shalt.err (!%p3242_p1)
}
 0x148   :  { %195 = dma.hbm_to_vmem [thread:$0]  %s4139_s19, 16, %s193_s13, [#allocation21]  }
 0x149   :  { %s3246_s10 = scalar_lea.hbm %s4141_s21, 16 }
 0x14a   :  { %p3247_p2 = scmp.ne.s32.totalorder %s4141_s21, %s3246_s10  ;;  %p3250_p3 = scmp.lt.u32.totalorder %s3246_s10, %s4141_s21 }
 0x14c   :  { %p3252_p4 = pnand %p3250_p3, %p3247_p2 }
 0x14e   :  { %3255 = shalt.err (!%p3252_p4)
}
 0x14f   :  { %s3256_s17 = scalar_lea.vmem %s215_s27, 16  ;;  %s3260_s12 = scalar_lea.vmem %s215_s27, 32 }
 0x150   :  { %p3257_p5 = scmp.ne.s32.totalorder %s215_s27, %s3256_s17  ;;  %p3261_p6 = scmp.lt.s32.totalorder %s215_s27, %s215_s27 }
 0x151   :  { %p3262_p7 = scmp.lt.s32.totalorder %s3260_s12, %s3256_s17 }
 0x153   :  { %p3263_p8 = por %p3262_p7, %p3261_p6 }
 0x155   :  { %p3264_p9 = pnand %p3263_p8, %p3257_p5 }
 0x157   :  { %3267 = shalt.err (!%p3264_p9)
}
 0x158   :  { %217 = dma.hbm_to_vmem [thread:$0]  %s4141_s21, 16, %s215_s27, [#allocation24]  }
 0x159   :  { %s3375_s5 = smov [#allocation28]   ;;  %s3376_s9 = smov [#allocation31]  }
 0x15a   :  { %s236_s13 = sshll.u32 %s3375_s5, 4  ;;  %s258_s6 = sshll.u32 %s3376_s9, 4  ;;  %s237_s13 = int_to_ptr.vmem [resolvable:$true] %s236_s13  ;;  %s259_s6 = int_to_ptr.vmem [resolvable:$true] %s258_s6 }
 0x15b   :  { %s3268_s30 = scalar_lea.hbm %s4143_s23, 16 }
 0x15c   :  { %p3269_p10 = scmp.ne.s32.totalorder %s4143_s23, %s3268_s30  ;;  %p3272_p11 = scmp.lt.u32.totalorder %s3268_s30, %s4143_s23 }
 0x15e   :  { %p3274_p12 = pnand %p3272_p11, %p3269_p10 }
 0x160   :  { %3277 = shalt.err (!%p3274_p12)
}
 0x161   :  { %s3278_s21 = scalar_lea.vmem %s237_s13, 16  ;;  %s3282_s27 = scalar_lea.vmem %s237_s13, 32 }
 0x162   :  { %p3279_p13 = scmp.ne.s32.totalorder %s237_s13, %s3278_s21  ;;  %p3283_p0 = scmp.lt.s32.totalorder %s237_s13, %s237_s13 }
 0x163   :  { %p3284_p1 = scmp.lt.s32.totalorder %s3282_s27, %s3278_s21 }
 0x165   :  { %p3285_p2 = por %p3284_p1, %p3283_p0 }
 0x167   :  { %p3286_p3 = pnand %p3285_p2, %p3279_p13 }
 0x169   :  { %3289 = shalt.err (!%p3286_p3)
}
 0x16a   :  { %239 = dma.hbm_to_vmem [thread:$0]  %s4143_s23, 16, %s237_s13, [#allocation27]  }
 0x16b   :  { %s3290_s20 = scalar_lea.hbm %s4145_s25, 16 }
 0x16c   :  { %p3291_p4 = scmp.ne.s32.totalorder %s4145_s25, %s3290_s20  ;;  %p3294_p5 = scmp.lt.u32.totalorder %s3290_s20, %s4145_s25 }
 0x16e   :  { %p3296_p6 = pnand %p3294_p5, %p3291_p4 }
 0x170   :  { %3299 = shalt.err (!%p3296_p6)
}
 0x171   :  { %s3300_s24 = scalar_lea.vmem %s259_s6, 16  ;;  %s3304_s17 = scalar_lea.vmem %s259_s6, 32 }
 0x172   :  { %p3301_p7 = scmp.ne.s32.totalorder %s259_s6, %s3300_s24  ;;  %p3305_p8 = scmp.lt.s32.totalorder %s259_s6, %s259_s6 }
 0x173   :  { %p3306_p9 = scmp.lt.s32.totalorder %s3304_s17, %s3300_s24 }
 0x175   :  { %p3307_p10 = por %p3306_p9, %p3305_p8 }
 0x177   :  { %p3308_p11 = pnand %p3307_p10, %p3301_p7 }
 0x179   :  { %3311 = shalt.err (!%p3308_p11)
}
 0x17a   :  { %261 = dma.hbm_to_vmem [thread:$0]  %s4145_s25, 16, %s259_s6, [#allocation30]  }
 0x17b   :  { %3334 = dma.done.wait [#allocation3], 32  }
 0x17c   :  { %3335 = vsyncadd [#allocation3], 4294967264 }
 0x17d   :  { %3336 = dma.done.wait [#allocation6], 160  }
 0x17e   :  { %3337 = vsyncadd [#allocation6], 4294967136 }
 0x17f   :  { %3338 = dma.done.wait [#allocation9], 1536  }
 0x180   :  { %3339 = vsyncadd [#allocation9], 4294965760 }
 0x181   :  { %3340 = dma.done.wait [#allocation12], 272  }
 0x182   :  { %3341 = vsyncadd [#allocation12], 4294967024 }
 0x183   :  { %3342 = dma.done.wait [#allocation15], 144  }
 0x184   :  { %3343 = vsyncadd [#allocation15], 4294967152 }
 0x185   :  { %3344 = dma.done.wait [#allocation18], 32  }
 0x186   :  { %3345 = vsyncadd [#allocation18], 4294967264 }
 0x187   :  { %3346 = dma.done.wait [#allocation21], 32  }
 0x188   :  { %3347 = vsyncadd [#allocation21], 4294967264 }
 0x189   :  { %3348 = dma.done.wait [#allocation24], 1040  }
 0x18a   :  { %3349 = vsyncadd [#allocation24], 4294966256 }
 0x18b   :  { %3350 = dma.done.wait [#allocation27], 1040  }
 0x18c   :  { %3351 = vsyncadd [#allocation27], 4294966256 }
 0x18d   :  { %3352 = dma.done.wait [#allocation30], 1040  }
 0x18e   :  { %3353 = vsyncadd [#allocation30], 4294966256  ;;  %v2788_v0 = vld [vmem:[#allocation7] sm:$0xff]   ;;  %vm356_vm0 = vcmask 130048   ;;  %s4179_s8 = sld [smem:[#allocation44_spill]]  ;;  %s4180_s30 = sld [smem:[#allocation49_spill]]  ;;  %v564_v29 = vlaneseq }
 0x18f   :  { %2458 = vmatprep.subr.bf16.mxu0 %v2788_v0  ;;  %vm478_vm1 = vcmask 523264   ;;  %v3377_v37 = vmov 0.0   ;;  %s4181_s20 = sld [smem:[#allocation51_spill]]  ;;  %s4182_s22 = sld [smem:[#allocation45_spill]]  ;;  %vm3378_vm15 = vmmov 0  }
 0x190   :  { %2459 = vmatpush3.bf16.msra.mxu0 %v2788_v0  ;;  %v3799_v30 = vshrl.u32 %v564_v29, 7  ;;  %v570_v34 = vand.u32 127, %v564_v29 }
 0x192   :  { %v566_v31 = vadd.s32 8, %v3799_v30  ;;  %v571_v32 = vmul.u32 2, %v3799_v30  ;;  %v567_v41 = vadd.s32 16, %v3799_v30  ;;  %v568_v42 = vadd.s32 24, %v3799_v30 }
 0x194   :  { %v2789_v1 = vld [vmem:[%s4179_s8] sm:$0xff]   ;;  %v2790_v2 = vld [vmem:[%s4179_s8 + $0x8] sm:$0xff]   ;;  %v2791_v3 = vld [vmem:[%s4179_s8 + $0x10] sm:$0xff]   ;;  %v572_v33 = vmul.u32 2, %v566_v31  ;;  %v579_v35 = vadd.s32 1, %v571_v32  ;;  %vm575_vm2 = vcmp.eq.s32.totalorder %v570_v34, %v571_v32  ;;  %v573_v46 = vmul.u32 2, %v567_v41 }
 0x195   :  { %2460 = vmatprep.mubr.msk.bf16.mxu0 %vm356_vm0, %v2789_v1  ;;  %v2793_v4 = vld [vmem:[%s4180_s30] sm:$0xff]   ;;  %v2794_v5 = vld [vmem:[%s4180_s30 + $0x8] sm:$0xff]   ;;  %v2792_v6 = vld [vmem:[%s4179_s8 + $0x18] sm:$0xff]   ;;  %v574_v50 = vmul.u32 2, %v568_v42 }
 0x196   :  { %2461 = vmatmul.mubr.msk.bf16.vlgmr.msra.gmra.mrb[0].mxu0 %vm356_vm0, %v2790_v2  ;;  %2468 = vmatprep.subr.bf16.mxu1 %v2793_v4  ;;  %v2795_v7 = vld [vmem:[%s4180_s30 + $0x10] sm:$0xff]   ;;  %v2796_v8 = vld [vmem:[%s4180_s30 + $0x18] sm:$0xff]   ;;  %v580_v36 = vadd.s32 1, %v572_v33  ;;  %vm576_vm3 = vcmp.eq.s32.totalorder %v570_v34, %v572_v33  ;;  %vm583_vm4 = vcmp.eq.s32.totalorder %v570_v34, %v579_v35  ;;  %v581_v55 = vadd.s32 1, %v573_v46  ;;  %v2228_v35 = vld [vmem:[%s4182_s22] ss:$0 sm:$0xff] }
 0x197   :  { %2464 = vmatprep.mubr.msk.bf16.mxu0 %vm356_vm0, %v2791_v3  ;;  %2469 = vmatpush3.bf16.msra.mxu1 %v2793_v4  ;;  %vm587_vm6 = vmor %vm575_vm2, %vm583_vm4  ;;  %v582_v56 = vadd.s32 1, %v574_v50  ;;  %vm577_vm8 = vcmp.eq.s32.totalorder %v570_v34, %v573_v46  ;;  %vm578_vm10 = vcmp.eq.s32.totalorder %v570_v34, %v574_v50  ;;  %vm873_vm14 = vcmp.eq.s32.totalorder %v3799_v30, %v2228_v35  ;;  %v2810_v50 = vld [vmem:[#allocation10 + $0x8] sm:$0xff]  }
 0x198   :  { %2470 = vmatprep.subr.bf16.mxu1 %v2794_v5  ;;  %vm584_vm5 = vcmp.eq.s32.totalorder %v570_v34, %v580_v36  ;;  %v591_v38 = vsel %vm587_vm6, 0.5, %v3377_v37  ;;  %vm585_vm9 = vcmp.eq.s32.totalorder %v570_v34, %v581_v55  ;;  %v2229_v36 = vsel %vm873_vm14, 1.0, %v3377_v37  ;;  %v2815_v55 = vld [vmem:[#allocation10 + $0x30] sm:$0xff]  }
 0x199   :  { %vm588_vm7 = vmor %vm576_vm3, %vm584_vm5  ;;  %vm586_vm11 = vcmp.eq.s32.totalorder %v570_v34, %v582_v56  ;;  %vm884_vm2 = vcmask 261120   ;;  %v2816_v56 = vld [vmem:[#allocation10 + $0x38] sm:$0xff]  }
 0x19a   :  { %v592_v39 = vsel %vm588_vm7, 0.5, %v3377_v37  ;;  %vm589_vm12 = vmor %vm577_vm8, %vm585_vm9 }
 0x19b   :  { %2471 = vmatpush3.bf16.msra.mxu1 %v2794_v5  ;;  %v595_v40 = vpack.c.bf16 %v592_v39, %v591_v38  ;;  %vm590_vm13 = vmor %vm578_vm10, %vm586_vm11  ;;  %v593_v3 = vsel %vm589_vm12, 0.5, %v3377_v37  ;;  %v2797_v5 = vld [vmem:[#allocation8] sm:$0xff]  }
 0x19c   :  { %2472 = vmatprep.subr.bf16.mxu1 %v2795_v7  ;;  %v594_v4 = vsel %vm590_vm13, 0.5, %v3377_v37 }
 0x19e   :  { %2465 = vmatmul.mubr.msk.bf16.gmra.mrb[4].mxu0 %vm356_vm0, %v2792_v6  ;;  %v596_v6 = vpack.c.bf16 %v594_v4, %v593_v3  ;;  %v2826_v3 = vld [vmem:[%s4134_s14 + $0x18] sm:$0xff]   ;;  %v2828_v4 = vld [vmem:[%s4134_s14 + $0x20] sm:$0xff]  }
 0x19f   :  { %2473 = vmatpush3.bf16.msra.mxu1 %v2795_v7  ;;  %v2798_v7 = vld [vmem:[#allocation8 + $0x8] sm:$0xff]  }
 0x1a0   :  { %2474 = vmatprep.subr.bf16.mxu1 %v2796_v8 }
 0x1a3   :  { %2475 = vmatpush3.bf16.msra.mxu1 %v2796_v8  ;;  %v2799_v8 = vld [vmem:[#allocation8 + $0x10] sm:$0xff]  }
 0x269   :  { %v2462_v9 = vpop.f32.mrb[0].mxu0 }
 0x26a   :  { %v403_v10 = vpop.f32.mrb[1].mxu0  ;;  %v436_v12 = vmax.f32 %v2462_v9, 0.0  ;;  %v2800_v9 = vld [vmem:[#allocation8 + $0x18] sm:$0xff]  }
 0x26b   :  { %v2463_v11 = vpop.f32.mrb[2].mxu0  ;;  %v434_v15 = vmax.f32 %v403_v10, 0.0  ;;  %v2801_v10 = vld [vmem:[%s4181_s20] sm:$0xff]  }
 0x26c   :  { %v437_v13 = vmax.f32 %v2463_v11, 0.0  ;;  %v406_v14 = vpop.f32.mrb[3].mxu0  ;;  %v2802_v11 = vld [vmem:[%s4181_s20 + $0x8] sm:$0xff]   ;;  %2508 = vmatprep.subr.bf16.mxu0 %v2801_v10 }
 0x26d   :  { %v435_v16 = vmax.f32 %v406_v14, 0.0  ;;  %2509 = vmatpush3.bf16.msra.mxu0 %v2801_v10  ;;  %v2805_v14 = vld [vmem:[%s4181_s20 + $0x20] sm:$0xff]  }
 0x26e   :  { %v443_v17 = vpack.c.bf16 %v437_v13, %v436_v12  ;;  %2510 = vmatprep.subr.bf16.mxu0 %v2802_v11  ;;  %v2803_v12 = vld [vmem:[%s4181_s20 + $0x10] sm:$0xff]   ;;  %v2804_v13 = vld [vmem:[%s4181_s20 + $0x18] sm:$0xff]  }
 0x26f   :  { %v442_v18 = vpack.c.bf16 %v435_v16, %v434_v15  ;;  %v2806_v15 = vld [vmem:[%s4181_s20 + $0x28] sm:$0xff]  }
 0x271   :  { %v2466_v19 = vpop.f32.mrb[4].mxu0  ;;  %2476 = vmatprep.mubr.msk.bf16.mxu1 %vm478_vm1, %v442_v18  ;;  %2511 = vmatpush3.bf16.msra.mxu0 %v2802_v11 }
 0x272   :  { %v419_v20 = vpop.f32.mrb[5].mxu0  ;;  %2477 = vmatmul.mubr.msk.bf16.vlgmr.msra.gmra.mrb[0].mxu1 %vm478_vm1, %v443_v17  ;;  %v440_v22 = vmax.f32 %v2466_v19, 0.0  ;;  %2512 = vmatprep.subr.bf16.mxu0 %v2803_v12 }
 0x273   :  { %v2467_v21 = vpop.f32.mrb[6].mxu0  ;;  %v438_v25 = vmax.f32 %v419_v20, 0.0 }
 0x274   :  { %v441_v23 = vmax.f32 %v2467_v21, 0.0  ;;  %v422_v24 = vpop.f32.mrb[7].mxu0 }
 0x275   :  { %v439_v26 = vmax.f32 %v422_v24, 0.0  ;;  %2513 = vmatpush3.bf16.msra.mxu0 %v2803_v12 }
 0x276   :  { %v445_v27 = vpack.c.bf16 %v441_v23, %v440_v22  ;;  %2514 = vmatprep.subr.bf16.mxu0 %v2804_v13  ;;  %v2807_v22 = vld [vmem:[%s4181_s20 + $0x30] sm:$0xff]   ;;  %v2808_v23 = vld [vmem:[%s4181_s20 + $0x38] sm:$0xff]  }
 0x277   :  { %v444_v28 = vpack.c.bf16 %v439_v26, %v438_v25 }
 0x279   :  { %2480 = vmatprep.mubr.msk.bf16.mxu1 %vm478_vm1, %v444_v28  ;;  %2515 = vmatpush3.bf16.msra.mxu0 %v2804_v13 }
 0x27a   :  { %2481 = vmatmul.mubr.msk.bf16.gmra.mrb[4].mxu1 %vm478_vm1, %v445_v27  ;;  %2516 = vmatprep.subr.bf16.mxu0 %v2805_v14 }
 0x27b   :  { %2492 = vmatprep.mubr.msk.bf16.mxu1 %vm478_vm1, %v595_v40 }
 0x27d   :  { %2517 = vmatpush3.bf16.msra.mxu0 %v2805_v14  ;;  %v2821_v14 = vld [vmem:[%s4136_s16] sm:$0xff]  }
 0x27e   :  { %2518 = vmatprep.subr.bf16.mxu0 %v2806_v15 }
 0x281   :  { %2519 = vmatpush3.bf16.msra.mxu0 %v2806_v15 }
 0x282   :  { %2520 = vmatprep.subr.bf16.mxu0 %v2807_v22 }
 0x285   :  { %2521 = vmatpush3.bf16.msra.mxu0 %v2807_v22  ;;  %v2833_v22 = vld [vmem:[%s4136_s16 + $0x30] sm:$0xff]  }
 0x286   :  { %2522 = vmatprep.subr.bf16.mxu0 %v2808_v23 }
 0x289   :  { %2523 = vmatpush3.bf16.msra.mxu0 %v2808_v23  ;;  %v2834_v23 = vld [vmem:[%s4134_s14 + $0x38] sm:$0xff]  }
 0x28a   :  { %2556 = vmatprep.subr.bf16.mxu0 %v3377_v37 }
 0x345   :  { %v2478_v43 = vpop.f32.mrb[0].mxu1 }
 0x346   :  { %v525_v44 = vpop.f32.mrb[1].mxu1  ;;  %v558_v47 = vmax.f32 %v2478_v43, 0.0 }
 0x347   :  { %v2479_v45 = vpop.f32.mrb[2].mxu1  ;;  %v556_v51 = vmax.f32 %v525_v44, 0.0 }
 0x348   :  { %v559_v48 = vmax.f32 %v2479_v45, 0.0  ;;  %v528_v49 = vpop.f32.mrb[3].mxu1 }
 0x349   :  { %v557_v52 = vmax.f32 %v528_v49, 0.0  ;;  %v2809_v49 = vld [vmem:[#allocation10] sm:$0xff]  }
 0x34a   :  { %v598_v53 = vpack.c.bf16 %v559_v48, %v558_v47  ;;  %v881_v48 = vpack.c.bf16 %v2229_v36, %v2229_v36 }
 0x34b   :  { %v597_v54 = vpack.c.bf16 %v557_v52, %v556_v51  ;;  %v2811_v51 = vld [vmem:[#allocation10 + $0x10] sm:$0xff]   ;;  %v2812_v52 = vld [vmem:[#allocation10 + $0x18] sm:$0xff]  }
 0x34d   :  { %v2482_v57 = vpop.f32.mrb[4].mxu1  ;;  %2484 = vmatprep.subr.bf16.mxu1 %v597_v54 }
 0x34e   :  { %v541_v58 = vpop.f32.mrb[5].mxu1  ;;  %2485 = vmatpush3.bf16.msra.mxu1 %v597_v54  ;;  %v562_v60 = vmax.f32 %v2482_v57, 0.0  ;;  %v2814_v54 = vld [vmem:[#allocation10 + $0x28] sm:$0xff]  }
 0x34f   :  { %v2483_v59 = vpop.f32.mrb[6].mxu1  ;;  %2486 = vmatprep.subr.bf16.mxu1 %v598_v53  ;;  %v560_v63 = vmax.f32 %v541_v58, 0.0  ;;  %v2817_v57 = vld [vmem:[#allocation13] sm:$0xff]   ;;  %v2818_v58 = vld [vmem:[#allocation13 + $0x8] sm:$0xff]  }
 0x350   :  { %v563_v61 = vmax.f32 %v2483_v59, 0.0  ;;  %v544_v62 = vpop.f32.mrb[7].mxu1  ;;  %v1042_v59 = vld [vmem:[#allocation2] sm:$0x3] }
 0x351   :  { %v561_v0 = vmax.f32 %v544_v62, 0.0  ;;  %v3866_v62 = vld [vmem:[#allocation5] sm:$0x3] }
 0x352   :  { %v600_v1 = vpack.c.bf16 %v563_v61, %v562_v60  ;;  %2487 = vmatpush3.bf16.msra.mxu1 %v598_v53  ;;  %v2813_v53 = vld [vmem:[#allocation10 + $0x20] sm:$0xff]   ;;  %v1043_v60 = vpack.c.bf16 %v1042_v59, %v1042_v59  ;;  %v2819_v61 = vld [vmem:[#allocation16] sm:$0xff]  }
 0x353   :  { %v599_v2 = vpack.c.bf16 %v561_v0, %v560_v63  ;;  %v1111_v63 = vpack.c.bf16 %v3866_v62, %v3866_v62  ;;  %v2820_v0 = vld [vmem:[%s4134_s14] sm:$0xff]  }
 0x355   :  { %2488 = vmatprep.subr.bf16.mxu1 %v599_v2 }
 0x356   :  { %2489 = vmatpush3.bf16.msra.mxu1 %v599_v2  ;;  %v2824_v2 = vld [vmem:[%s4134_s14 + $0x10] sm:$0xff]  }
 0x357   :  { %2490 = vmatprep.subr.bf16.mxu1 %v600_v1 }
 0x35a   :  { %2491 = vmatpush3.bf16.msra.mxu1 %v600_v1  ;;  %v2822_v1 = vld [vmem:[%s4134_s14 + $0x8] sm:$0xff]  }
 0x35b   :  { %2496 = vmatprep.subr.bf16.mxu1 %v2797_v5 }
 0x35d   :  { %2493 = vmatmul.mubr.msk.bf16.vlgmr.msra.gmra.mrb[8].mxu1 %vm478_vm1, %v596_v6  ;;  %v2832_v6 = vld [vmem:[%s4134_s14 + $0x30] sm:$0xff]  }
 0x35e   :  { %2497 = vmatpush3.bf16.msra.mxu1 %v2797_v5  ;;  %v2830_v5 = vld [vmem:[%s4134_s14 + $0x28] sm:$0xff]  }
 0x35f   :  { %2498 = vmatprep.subr.bf16.mxu1 %v2798_v7 }
 0x362   :  { %2499 = vmatpush3.bf16.msra.mxu1 %v2798_v7 }
 0x363   :  { %2500 = vmatprep.subr.bf16.mxu1 %v2799_v8 }
 0x366   :  { %2501 = vmatpush3.bf16.msra.mxu1 %v2799_v8 }
 0x367   :  { %2502 = vmatprep.subr.bf16.mxu1 %v2800_v9 }
 0x36a   :  { %2503 = vmatpush3.bf16.msra.mxu1 %v2800_v9 }
 0x36b   :  { %2528 = vmatprep.subr.bf16.mxu1 %v3377_v37 }
 0x430   :  { %v2494_v16 = vpop.f32.mrb[8].mxu1 }
 0x431   :  { %v641_v17 = vpop.f32.mrb[9].mxu1 }
 0x432   :  { %v2495_v18 = vpop.f32.mrb[10].mxu1 }
 0x433   :  { %v657_v19 = vpack.c.bf16 %v2495_v18, %v2494_v16  ;;  %v644_v20 = vpop.f32.mrb[11].mxu1  ;;  %v2825_v18 = vld [vmem:[%s4136_s16 + $0x10] sm:$0xff]  }
 0x434   :  { %v656_v21 = vpack.c.bf16 %v644_v20, %v641_v17  ;;  %v2823_v17 = vld [vmem:[%s4136_s16 + $0x8] sm:$0xff]   ;;  %v2829_v20 = vld [vmem:[%s4136_s16 + $0x20] sm:$0xff]  }
 0x436   :  { %2504 = vmatprep.mubr.msk.bf16.mxu1 %vm478_vm1, %v656_v21  ;;  %v2831_v21 = vld [vmem:[%s4136_s16 + $0x28] sm:$0xff]  }
 0x437   :  { %2505 = vmatmul.mubr.msk.bf16.vlgmr.msra.gmra.mrb[12].mxu1 %vm478_vm1, %v657_v19  ;;  %vm876_vm1 = vcmask 254976   ;;  %v2827_v19 = vld [vmem:[%s4136_s16 + $0x18] sm:$0xff]  }
 0x438   :  { %2532 = vmatprep.mubr.msk.bf16.mxu1 %vm3378_vm15, %v3377_v37  ;;  %v877_v38 = vsel %vm876_vm1, %v2229_v36, 0.0 }
 0x439   :  { %878 = vadd.xlane.f32.xlu0 %v877_v38 }
 0x4c6   :  { %v879_v7 = vpop.xlane.xlu0 %878 }
 0x4c7   :  { %v880_v8 = vmax.f32 %v879_v7, 1.0  ;;  %v2857_v7 = vld [vmem:[%s4136_s16 + $0xa8] sm:$0xff]  }
 0x4c9   :  { %2892 = vrcp.f32 %v880_v8  ;;  %v2865_v8 = vld [vmem:[#allocation26 + $0x28] sm:$0xff]  }
 0x4d3   :  { %v2893_v9 = vpop.eup %2892 }
 0x50a   :  { %v2506_v24 = vpop.f32.mrb[12].mxu1 }
 0x50b   :  { %v730_v25 = vpop.f32.mrb[13].mxu1  ;;  %v747_v27 = vmax.f32 %v2506_v24, 0.0  ;;  %v2835_v24 = vld [vmem:[%s4136_s16 + $0x38] sm:$0xff]  }
 0x50c   :  { %v2507_v26 = vpop.f32.mrb[14].mxu1  ;;  %v745_v31 = vmax.f32 %v730_v25, 0.0 }
 0x50d   :  { %v748_v28 = vmax.f32 %v2507_v26, 0.0  ;;  %v733_v29 = vpop.f32.mrb[15].mxu1 }
 0x50e   :  { %v746_v32 = vmax.f32 %v733_v29, 0.0 }
 0x50f   :  { %v750_v33 = vpack.c.bf16 %v748_v28, %v747_v27 }
 0x510   :  { %v749_v34 = vpack.c.bf16 %v746_v32, %v745_v31 }
 0x512   :  { %2524 = vmatprep.mubr.bf16.mxu0 %v749_v34  ;;  %v2231_v34 = vld [vmem:[#allocation11] ss:$0 sm:$0xff] }
 0x513   :  { %2525 = vmatmul.mubr.bf16.vlgmr.msra.gmra.mrb[8].mxu0 %v750_v33 }
 0x514   :  { %2560 = vmatprep.mubr.msk.bf16.mxu0 %vm3378_vm15, %v3377_v37  ;;  %2557 = vmatpush3.bf16.msra.mxu0 %v2817_v57  ;;  %v2850_v57 = vld [vmem:[%s4134_s14 + $0x78] sm:$0xff]  }
 0x515   :  { %2558 = vmatprep.subr.bf16.mxu0 %v3377_v37 }
 0x518   :  { %2559 = vmatpush3.bf16.msra.mxu0 %v2818_v58  ;;  %v2851_v58 = vld [vmem:[%s4136_s16 + $0x78] sm:$0xff]  }
 0x519   :  { %2564 = vmatprep.subr.bf16.mxu0 %v3377_v37 }
 0x51b   :  { %2561 = vmatmul.mubr.msk.bf16.vlgmr.msra.gmra.mrb[12].mxu0 %vm884_vm2, %v1043_v60  ;;  %v2852_v60 = vld [vmem:[%s4136_s16 + $0x80] sm:$0xff]  }
 0x51c   :  { %2565 = vmatpush3.bf16.msra.mxu0 %v2819_v61  ;;  %2566 = vmatprep.mubr.msk.bf16.mxu0 %vm3378_vm15, %v3377_v37  ;;  %v2860_v61 = vld [vmem:[#allocation26] sm:$0xff]  }
 0x51d   :  { %2570 = vmatprep.subr.bf16.mxu0 %v3377_v37 }
 0x523   :  { %2567 = vmatmul.mubr.msk.bf16.vlgmr.msra.gmra.mrb[16].mxu0 %vm356_vm0, %v1111_v63  ;;  %v2853_v63 = vld [vmem:[%s4136_s16 + $0x88] sm:$0xff]   ;;  %vm2162_vm0 = vcmask 123904  }
 0x524   :  { %2571 = vmatpush3.bf16.msra.mxu0 %v2820_v0  ;;  %2586 = vmatprep.mubr.msk.bf16.mxu0 %vm3378_vm15, %v3377_v37  ;;  %v2861_v0 = vld [vmem:[#allocation26 + $0x8] sm:$0xff]  }
 0x525   :  { %2572 = vmatprep.subr.bf16.mxu0 %v3377_v37 }
 0x528   :  { %2573 = vmatpush3.bf16.msra.mxu0 %v2822_v1  ;;  %v2854_v1 = vld [vmem:[%s4136_s16 + $0x90] sm:$0xff]  }
 0x529   :  { %2574 = vmatprep.subr.bf16.mxu0 %v3377_v37 }
 0x52c   :  { %2575 = vmatpush3.bf16.msra.mxu0 %v2824_v2  ;;  %v2862_v2 = vld [vmem:[#allocation26 + $0x10] sm:$0xff]  }
 0x52d   :  { %2576 = vmatprep.subr.bf16.mxu0 %v3377_v37 }
 0x530   :  { %2577 = vmatpush3.bf16.msra.mxu0 %v2826_v3  ;;  %v2855_v3 = vld [vmem:[%s4136_s16 + $0x98] sm:$0xff]  }
 0x531   :  { %2578 = vmatprep.subr.bf16.mxu0 %v3377_v37 }
 0x534   :  { %2579 = vmatpush3.bf16.msra.mxu0 %v2828_v4  ;;  %v2863_v4 = vld [vmem:[#allocation26 + $0x18] sm:$0xff]  }
 0x535   :  { %2580 = vmatprep.subr.bf16.mxu0 %v3377_v37 }
 0x538   :  { %2581 = vmatpush3.bf16.msra.mxu0 %v2830_v5  ;;  %v2856_v5 = vld [vmem:[%s4136_s16 + $0xa0] sm:$0xff]  }
 0x539   :  { %2582 = vmatprep.subr.bf16.mxu0 %v3377_v37 }
 0x53c   :  { %2583 = vmatpush3.bf16.msra.mxu0 %v2832_v6  ;;  %v2864_v6 = vld [vmem:[#allocation26 + $0x20] sm:$0xff]  }
 0x53d   :  { %2584 = vmatprep.subr.bf16.mxu0 %v3377_v37 }
 0x540   :  { %2585 = vmatpush3.bf16.msra.mxu0 %v2834_v23 }
 0x541   :  { %2590 = vmatprep.subr.bf16.mxu0 %v3377_v37 }
 0x5e6   :  { %v2526_v39 = vpop.f32.mrb[8].mxu0 }
 0x5e7   :  { %v849_v40 = vpop.f32.mrb[9].mxu0  ;;  %v866_v42 = vmax.f32 %v2526_v39, 0.0 }
 0x5e8   :  { %v2527_v41 = vpop.f32.mrb[10].mxu0  ;;  %v864_v45 = vmax.f32 %v849_v40, 0.0  ;;  %v2836_v40 = vld [vmem:[%s4134_s14 + $0x40] sm:$0xff]  }
 0x5e9   :  { %v867_v43 = vmax.f32 %v2527_v41, 0.0  ;;  %v852_v44 = vpop.f32.mrb[11].mxu0  ;;  %v2837_v41 = vld [vmem:[%s4136_s16 + $0x40] sm:$0xff]  }
 0x5ea   :  { %v865_v30 = vmax.f32 %v852_v44, 0.0  ;;  %v2838_v44 = vld [vmem:[%s4134_s14 + $0x48] sm:$0xff]  }
 0x5eb   :  { %v883_v46 = vpack.c.bf16 %v867_v43, %v866_v42 }
 0x5ec   :  { %v882_v47 = vpack.c.bf16 %v865_v30, %v864_v45  ;;  %v2839_v45 = vld [vmem:[%s4136_s16 + $0x48] sm:$0xff]   ;;  %v2840_v30 = vld [vmem:[%s4134_s14 + $0x50] sm:$0xff]  }
 0x5ee   :  { %2529 = vmatpush3.bf16.msra.mxu1 %v882_v47  ;;  %v1104_v25 = vpop.f32.mrb[12].mxu0  ;;  %v2842_v47 = vld [vmem:[%s4134_s14 + $0x58] sm:$0xff]  }
 0x5ef   :  { %2530 = vmatprep.subr.bf16.mxu1 %v3377_v37  ;;  %v2562_v26 = vpop.f32.mrb[13].mxu0 }
 0x5f0   :  { %v1107_v27 = vpop.f32.mrb[14].mxu0 }
 0x5f1   :  { %v2563_v28 = vpop.f32.mrb[15].mxu0 }
 0x5f2   :  { %2531 = vmatpush3.bf16.msra.mxu1 %v883_v46  ;;  %v2841_v46 = vld [vmem:[%s4136_s16 + $0x50] sm:$0xff]  }
 0x5f3   :  { %2536 = vmatprep.subr.bf16.mxu1 %v3377_v37 }
 0x5f5   :  { %2533 = vmatmul.mubr.msk.bf16.vlgmr.msra.gmra.mrb[16].mxu1 %vm884_vm2, %v881_v48  ;;  %v2843_v48 = vld [vmem:[%s4136_s16 + $0x58] sm:$0xff]  }
 0x5f6   :  { %2537 = vmatpush3.bf16.msra.mxu1 %v2809_v49  ;;  %2552 = vmatprep.mubr.msk.bf16.mxu1 %vm3378_vm15, %v3377_v37  ;;  %v3940_v29 = vpop.f32.mrb[16].mxu0  ;;  %v2844_v49 = vld [vmem:[%s4134_s14 + $0x60] sm:$0xff]  }
 0x5f7   :  { %2538 = vmatprep.subr.bf16.mxu1 %v3377_v37  ;;  %v2568_v31 = vpop.f32.mrb[17].mxu0 }
 0x5f8   :  { %v1167_v32 = vpop.f32.mrb[18].mxu0 }
 0x5f9   :  { %v2569_v33 = vpop.f32.mrb[19].mxu0 }
 0x5fa   :  { %2539 = vmatpush3.bf16.msra.mxu1 %v2810_v50  ;;  %v2845_v50 = vld [vmem:[%s4136_s16 + $0x60] sm:$0xff]  }
 0x5fb   :  { %2540 = vmatprep.subr.bf16.mxu1 %v3377_v37  ;;  %v2877_v33 = vld [vmem:[#allocation29 + $0x8] sm:$0xff]  }
 0x5fe   :  { %2541 = vmatpush3.bf16.msra.mxu1 %v2811_v51  ;;  %v2846_v51 = vld [vmem:[%s4134_s14 + $0x68] sm:$0xff]  }
 0x5ff   :  { %2542 = vmatprep.subr.bf16.mxu1 %v3377_v37 }
 0x602   :  { %2543 = vmatpush3.bf16.msra.mxu1 %v2812_v52  ;;  %v2847_v52 = vld [vmem:[%s4136_s16 + $0x68] sm:$0xff]  }
 0x603   :  { %2544 = vmatprep.subr.bf16.mxu1 %v3377_v37 }
 0x606   :  { %2545 = vmatpush3.bf16.msra.mxu1 %v2813_v53  ;;  %v2848_v53 = vld [vmem:[%s4134_s14 + $0x70] sm:$0xff]   ;;  %s3379_s14 = smov [#allocation32]  }
 0x607   :  { %2546 = vmatprep.subr.bf16.mxu1 %v3377_v37  ;;  %s2177_s7 = sshll.u32 %s3379_s14, 4  ;;  %s2178_s7 = int_to_ptr.vmem [resolvable:$true] %s2177_s7 }
 0x608   :  { %s3312_s3 = scalar_lea.vmem %s2178_s7, 32  ;;  %p3317_p13 = scmp.lt.s32.totalorder %s2178_s7, %s2178_s7 }
 0x609   :  { %p3313_p12 = scmp.ne.s32.totalorder %s2178_s7, %s3312_s3  ;;  %p3318_p0 = scmp.lt.s32.totalorder %s3312_s3, %s3312_s3 }
 0x60a   :  { %2547 = vmatpush3.bf16.msra.mxu1 %v2814_v54  ;;  %v2849_v54 = vld [vmem:[%s4136_s16 + $0x70] sm:$0xff]  }
 0x60b   :  { %2548 = vmatprep.subr.bf16.mxu1 %v3377_v37  ;;  %p3319_p1 = por %p3318_p0, %p3317_p13 }
 0x60d   :  { %p3320_p2 = pnand %p3319_p1, %p3313_p12 }
 0x60e   :  { %2549 = vmatpush3.bf16.msra.mxu1 %v2815_v55  ;;  %v2240_v55 = vld [vmem:[#allocation14] ss:$0 sm:$0xff] }
 0x60f   :  { %2550 = vmatprep.subr.bf16.mxu1 %v3377_v37 }
 0x612   :  { %2551 = vmatpush3.bf16.msra.mxu1 %v2816_v56  ;;  %v1105_v56 = vadd.f32 %v2240_v55, %v1104_v25  ;;  %v2884_v55 = vld [vmem:[#allocation23] sm:$0xff]  }
 0x613   :  { %2610 = vmatprep.subr.bf16.mxu1 %v3377_v37 }
 0x614   :  { %v1283_v59 = vpack.c.bf16 %v1105_v56, %v1105_v56 }
 0x6c8   :  { %v922_v10 = vpop.f32.mrb[16].mxu1 }
 0x6c9   :  { %v929_v11 = vmul.f32 %v2893_v9, %v922_v10  ;;  %v2534_v12 = vpop.f32.mrb[17].mxu1  ;;  %v2244_v9 = vld [vmem:[#allocation17] ss:$0 sm:$0xff]  ;;  %v2858_v10 = vld [vmem:[%s4136_s16 + $0xb0] sm:$0xff]  }
 0x6ca   :  { %v925_v13 = vpop.f32.mrb[18].mxu1  ;;  %v1165_v12 = vadd.f32 %v2244_v9, %v3940_v29  ;;  %v2876_v29 = vld [vmem:[#allocation29] sm:$0xff]  }
 0x6cb   :  { %v930_v15 = vpack.c.bf16 %v929_v11, %v929_v11  ;;  %v2535_v16 = vpop.f32.mrb[19].mxu1  ;;  %v2866_v11 = vld [vmem:[#allocation26 + $0x30] sm:$0xff]   ;;  %v2859_v13 = vld [vmem:[%s4136_s16 + $0xb8] sm:$0xff]   ;;  %s4183_s16 = sld [smem:[#allocation55_spill]] }
 0x6cd   :  { %2553 = vmatmul.mubr.bf16.vlgmr.msra.gmra.mrb[20].mxu1 %v930_v15  ;;  %v2867_v15 = vld [vmem:[#allocation26 + $0x38] sm:$0xff]  }
 0x6ce   :  { %2611 = vmatpush3.bf16.msra.mxu1 %v2821_v14  ;;  %2626 = vmatprep.mubr.msk.bf16.mxu1 %vm3378_vm15, %v3377_v37  ;;  %v1606_v14 = vpack.c.bf16 %v1165_v12, %v1165_v12 }
 0x6cf   :  { %2612 = vmatprep.subr.bf16.mxu1 %v3377_v37 }
 0x6d1   :  { %v2868_v16 = vld [vmem:[%s4183_s16] sm:$0xff]   ;;  %v2875_v23 = vld [vmem:[%s4183_s16 + $0x38] sm:$0xff]  }
 0x6d2   :  { %2613 = vmatpush3.bf16.msra.mxu1 %v2823_v17  ;;  %v2869_v17 = vld [vmem:[%s4183_s16 + $0x8] sm:$0xff]  }
 0x6d3   :  { %2614 = vmatprep.subr.bf16.mxu1 %v3377_v37 }
 0x6d6   :  { %2615 = vmatpush3.bf16.msra.mxu1 %v2825_v18  ;;  %v2870_v18 = vld [vmem:[%s4183_s16 + $0x10] sm:$0xff]  }
 0x6d7   :  { %2616 = vmatprep.subr.bf16.mxu1 %v3377_v37 }
 0x6da   :  { %2617 = vmatpush3.bf16.msra.mxu1 %v2827_v19  ;;  %v2871_v19 = vld [vmem:[%s4183_s16 + $0x18] sm:$0xff]  }
 0x6db   :  { %2618 = vmatprep.subr.bf16.mxu1 %v3377_v37 }
 0x6de   :  { %2619 = vmatpush3.bf16.msra.mxu1 %v2829_v20  ;;  %v2872_v20 = vld [vmem:[%s4183_s16 + $0x20] sm:$0xff]  }
 0x6df   :  { %2620 = vmatprep.subr.bf16.mxu1 %v3377_v37 }
 0x6e2   :  { %2621 = vmatpush3.bf16.msra.mxu1 %v2831_v21  ;;  %v2873_v21 = vld [vmem:[%s4183_s16 + $0x28] sm:$0xff]  }
 0x6e3   :  { %2622 = vmatprep.subr.bf16.mxu1 %v3377_v37 }
 0x6e6   :  { %2623 = vmatpush3.bf16.msra.mxu1 %v2833_v22  ;;  %v2874_v22 = vld [vmem:[%s4183_s16 + $0x30] sm:$0xff]  }
 0x6e7   :  { %2624 = vmatprep.subr.bf16.mxu1 %v3377_v37 }
 0x6ea   :  { %2625 = vmatpush3.bf16.msra.mxu1 %v2835_v24  ;;  %v2255_v24 = vld [vmem:[#allocation19] ss:$0 sm:$0xff] }
 0x6eb   :  { %2630 = vmatprep.subr.bf16.mxu1 %v3377_v37 }
 0x7a0   :  { %v1036_v35 = vpop.f32.mrb[20].mxu1 }
 0x7a1   :  { %v1037_v36 = vadd.f32 %v2231_v34, %v1036_v35  ;;  %v2554_v38 = vpop.f32.mrb[21].mxu1  ;;  %v2878_v34 = vld [vmem:[#allocation29 + $0x10] sm:$0xff]   ;;  %v2879_v35 = vld [vmem:[#allocation29 + $0x18] sm:$0xff]  }
 0x7a2   :  { %v1039_v39 = vpop.f32.mrb[22].mxu1  ;;  %v2881_v38 = vld [vmem:[#allocation29 + $0x28] sm:$0xff]  }
 0x7a3   :  { %v1171_v42 = vpack.c.bf16 %v1037_v36, %v1037_v36  ;;  %v2555_v43 = vpop.f32.mrb[23].mxu1  ;;  %v2880_v36 = vld [vmem:[#allocation29 + $0x20] sm:$0xff]   ;;  %v2272_v39 = vld [vmem:[#allocation20] ss:$0 sm:$0xff] }
 0x7a5   :  { %2587 = vmatmul.mubr.bf16.vlgmr.msra.gmra.mrb[20].mxu0 %v1171_v42  ;;  %2627 = vmatmul.mubr.bf16.vlgmr.msra.gmra.mrb[24].mxu1 %v1171_v42 }
 0x7a6   :  { %2591 = vmatpush3.bf16.msra.mxu0 %v2836_v40  ;;  %2631 = vmatpush3.bf16.msra.mxu1 %v2837_v41 }
 0x7a7   :  { %2592 = vmatprep.subr.bf16.mxu0 %v3377_v37  ;;  %2632 = vmatprep.subr.bf16.mxu1 %v3377_v37 }
 0x7a8   :  { %2606 = vmatprep.mubr.msk.bf16.mxu0 %vm3378_vm15, %v3377_v37  ;;  %2646 = vmatprep.mubr.msk.bf16.mxu1 %vm3378_vm15, %v3377_v37 }
 0x7aa   :  { %2593 = vmatpush3.bf16.msra.mxu0 %v2838_v44  ;;  %2633 = vmatpush3.bf16.msra.mxu1 %v2839_v45 }
 0x7ab   :  { %2594 = vmatprep.subr.bf16.mxu0 %v3377_v37  ;;  %2634 = vmatprep.subr.bf16.mxu1 %v3377_v37 }
 0x7ae   :  { %2595 = vmatpush3.bf16.msra.mxu0 %v2840_v30  ;;  %2635 = vmatpush3.bf16.msra.mxu1 %v2841_v46  ;;  %v2882_v30 = vld [vmem:[#allocation29 + $0x30] sm:$0xff]   ;;  %v2883_v46 = vld [vmem:[#allocation29 + $0x38] sm:$0xff]  }
 0x7af   :  { %2596 = vmatprep.subr.bf16.mxu0 %v3377_v37  ;;  %2636 = vmatprep.subr.bf16.mxu1 %v3377_v37 }
 0x7b2   :  { %2597 = vmatpush3.bf16.msra.mxu0 %v2842_v47  ;;  %2637 = vmatpush3.bf16.msra.mxu1 %v2843_v48  ;;  %v2163_v47 = vsel %vm2162_vm0, %v3866_v62, 0.0  ;;  %v2289_v48 = vld [vmem:[#allocation28] ss:$0 sm:$0xff]  ;;  %v2886_v62 = vld [vmem:[#allocation23 + $0x10] sm:$0xff]  }
 0x7b3   :  { %2598 = vmatprep.subr.bf16.mxu0 %v3377_v37  ;;  %2638 = vmatprep.subr.bf16.mxu1 %v3377_v37 }
 0x7b4   :  { %2164 = vadd.xlane.f32.xlu0 %v2163_v47 }
 0x7b6   :  { %2599 = vmatpush3.bf16.msra.mxu0 %v2844_v49  ;;  %2639 = vmatpush3.bf16.msra.mxu1 %v2845_v50 }
 0x7b7   :  { %2600 = vmatprep.subr.bf16.mxu0 %v3377_v37  ;;  %2640 = vmatprep.subr.bf16.mxu1 %v3377_v37 }
 0x7ba   :  { %2601 = vmatpush3.bf16.msra.mxu0 %v2846_v51  ;;  %2641 = vmatpush3.bf16.msra.mxu1 %v2847_v52 }
 0x7bb   :  { %2602 = vmatprep.subr.bf16.mxu0 %v3377_v37  ;;  %2642 = vmatprep.subr.bf16.mxu1 %v3377_v37 }
 0x7be   :  { %2603 = vmatpush3.bf16.msra.mxu0 %v2848_v53  ;;  %2643 = vmatpush3.bf16.msra.mxu1 %v2849_v54 }
 0x7bf   :  { %2604 = vmatprep.subr.bf16.mxu0 %v3377_v37  ;;  %2644 = vmatprep.subr.bf16.mxu1 %v3377_v37 }
 0x7c2   :  { %2605 = vmatpush3.bf16.msra.mxu0 %v2850_v57  ;;  %2645 = vmatpush3.bf16.msra.mxu1 %v2851_v58  ;;  %v2885_v57 = vld [vmem:[#allocation23 + $0x8] sm:$0xff]   ;;  %v2887_v58 = vld [vmem:[#allocation23 + $0x18] sm:$0xff]  }
 0x7c3   :  { %2650 = vmatprep.subr.bf16.mxu1 %v3377_v37  ;;  %2670 = vmatprep.subr.bf16.mxu0 %v3377_v37 }
 0x7c5   :  { %2607 = vmatmul.mubr.bf16.vlgmr.msra.gmra.mrb[20].mxu0 %v1283_v59  ;;  %2647 = vmatmul.mubr.bf16.vlgmr.msra.gmra.mrb[24].mxu1 %v1283_v59  ;;  %v2888_v59 = vld [vmem:[#allocation23 + $0x20] sm:$0xff]  }
 0x7c6   :  { %2651 = vmatpush3.bf16.msra.mxu1 %v2852_v60  ;;  %2666 = vmatprep.mubr.msk.bf16.mxu1 %vm3378_vm15, %v3377_v37  ;;  %v2889_v60 = vld [vmem:[#allocation23 + $0x28] sm:$0xff]  }
 0x7c7   :  { %2652 = vmatprep.subr.bf16.mxu1 %v3377_v37  ;;  %2671 = vmatpush3.bf16.msra.mxu0 %v2860_v61  ;;  %v2890_v61 = vld [vmem:[#allocation23 + $0x30] sm:$0xff]  }
 0x7c8   :  { %2672 = vmatprep.subr.bf16.mxu0 %v3377_v37  ;;  %2686 = vmatprep.mubr.msk.bf16.mxu0 %vm3378_vm15, %v3377_v37 }
 0x7ca   :  { %2653 = vmatpush3.bf16.msra.mxu1 %v2853_v63  ;;  %v2307_v63 = vld [vmem:[#allocation22] ss:$0 sm:$0xff] }
 0x7cb   :  { %2654 = vmatprep.subr.bf16.mxu1 %v3377_v37  ;;  %2673 = vmatpush3.bf16.msra.mxu0 %v2861_v0 }
 0x7cc   :  { %2674 = vmatprep.subr.bf16.mxu0 %v3377_v37 }
 0x7ce   :  { %2655 = vmatpush3.bf16.msra.mxu1 %v2854_v1  ;;  %v2891_v1 = vld [vmem:[#allocation23 + $0x38] sm:$0xff]  }
 0x7cf   :  { %2656 = vmatprep.subr.bf16.mxu1 %v3377_v37  ;;  %2675 = vmatpush3.bf16.msra.mxu0 %v2862_v2 }
 0x7d0   :  { %2676 = vmatprep.subr.bf16.mxu0 %v3377_v37 }
 0x7d2   :  { %2657 = vmatpush3.bf16.msra.mxu1 %v2855_v3 }
 0x7d3   :  { %2658 = vmatprep.subr.bf16.mxu1 %v3377_v37  ;;  %2677 = vmatpush3.bf16.msra.mxu0 %v2863_v4 }
 0x7d4   :  { %2678 = vmatprep.subr.bf16.mxu0 %v3377_v37 }
 0x7d6   :  { %2659 = vmatpush3.bf16.msra.mxu1 %v2856_v5 }
 0x7d7   :  { %2660 = vmatprep.subr.bf16.mxu1 %v3377_v37  ;;  %2679 = vmatpush3.bf16.msra.mxu0 %v2864_v6 }
 0x7d8   :  { %2680 = vmatprep.subr.bf16.mxu0 %v3377_v37 }
 0x7da   :  { %2661 = vmatpush3.bf16.msra.mxu1 %v2857_v7 }
 0x7db   :  { %2662 = vmatprep.subr.bf16.mxu1 %v3377_v37  ;;  %2681 = vmatpush3.bf16.msra.mxu0 %v2865_v8 }
 0x7dc   :  { %2682 = vmatprep.subr.bf16.mxu0 %v3377_v37 }
 0x7de   :  { %2663 = vmatpush3.bf16.msra.mxu1 %v2858_v10 }
 0x7df   :  { %2664 = vmatprep.subr.bf16.mxu1 %v3377_v37  ;;  %2683 = vmatpush3.bf16.msra.mxu0 %v2866_v11 }
 0x7e0   :  { %2684 = vmatprep.subr.bf16.mxu0 %v3377_v37 }
 0x7e2   :  { %2665 = vmatpush3.bf16.msra.mxu1 %v2859_v13  ;;  %v2298_v13 = vld [vmem:[#allocation31] ss:$0 sm:$0xff] }
 0x7e3   :  { %2710 = vmatprep.subr.bf16.mxu1 %v3377_v37  ;;  %2685 = vmatpush3.bf16.msra.mxu0 %v2867_v15 }
 0x7e4   :  { %2690 = vmatprep.subr.bf16.mxu0 %v3377_v37 }
 0x7e5   :  { %2667 = vmatmul.mubr.bf16.vlgmr.msra.gmra.mrb[24].mxu1 %v1606_v14  ;;  %v2316_v14 = vld [vmem:[#allocation25] ss:$0 sm:$0xff] }
 0x7e6   :  { %2726 = vmatprep.mubr.msk.bf16.mxu1 %vm3378_vm15, %v3377_v37  ;;  %2711 = vmatpush3.bf16.msra.mxu1 %v2868_v16 }
 0x7e7   :  { %2712 = vmatprep.subr.bf16.mxu1 %v3377_v37 }
 0x7ea   :  { %2713 = vmatpush3.bf16.msra.mxu1 %v2869_v17 }
 0x7eb   :  { %2714 = vmatprep.subr.bf16.mxu1 %v3377_v37 }
 0x7ee   :  { %2715 = vmatpush3.bf16.msra.mxu1 %v2870_v18 }
 0x7ef   :  { %2716 = vmatprep.subr.bf16.mxu1 %v3377_v37 }
 0x7f2   :  { %2717 = vmatpush3.bf16.msra.mxu1 %v2871_v19 }
 0x7f3   :  { %2718 = vmatprep.subr.bf16.mxu1 %v3377_v37 }
 0x7f6   :  { %2719 = vmatpush3.bf16.msra.mxu1 %v2872_v20 }
 0x7f7   :  { %2720 = vmatprep.subr.bf16.mxu1 %v3377_v37 }
 0x7fa   :  { %2721 = vmatpush3.bf16.msra.mxu1 %v2873_v21 }
 0x7fb   :  { %2722 = vmatprep.subr.bf16.mxu1 %v3377_v37 }
 0x7fe   :  { %2723 = vmatpush3.bf16.msra.mxu1 %v2874_v22 }
 0x7ff   :  { %2724 = vmatprep.subr.bf16.mxu1 %v3377_v37 }
 0x802   :  { %2725 = vmatpush3.bf16.msra.mxu1 %v2875_v23 }
 0x841   :  { %v2165_v12 = vpop.xlane.xlu0 %2164 }
 0x842   :  { %vm2166_vm3 = vcmp.ne.f32.partialorder %v2165_v12, 0.0 }
 0x898   :  { %v1382_v25 = vpop.f32.mrb[20].mxu0 }
 0x899   :  { %v2750_v26 = vadd.f32 %v2255_v24, %v1382_v25  ;;  %v2608_v27 = vpop.f32.mrb[21].mxu0 }
 0x89a   :  { %v1385_v28 = vpop.f32.mrb[22].mxu0 }
 0x89b   :  { %v1712_v31 = vpack.c.bf16 %v2750_v26, %v2750_v26  ;;  %v2609_v32 = vpop.f32.mrb[23].mxu0 }
 0x89d   :  { %2687 = vmatmul.mubr.bf16.vlgmr.msra.gmra.mrb[24].mxu0 %v1712_v31 }
 0x89e   :  { %2691 = vmatpush3.bf16.msra.mxu0 %v2876_v29  ;;  %2706 = vmatprep.mubr.msk.bf16.mxu0 %vm3378_vm15, %v3377_v37 }
 0x89f   :  { %2692 = vmatprep.subr.bf16.mxu0 %v3377_v37 }
 0x8a2   :  { %2693 = vmatpush3.bf16.msra.mxu0 %v2877_v33 }
 0x8a3   :  { %2694 = vmatprep.subr.bf16.mxu0 %v3377_v37 }
 0x8a6   :  { %2695 = vmatpush3.bf16.msra.mxu0 %v2878_v34 }
 0x8a7   :  { %2696 = vmatprep.subr.bf16.mxu0 %v3377_v37 }
 0x8aa   :  { %2697 = vmatpush3.bf16.msra.mxu0 %v2879_v35 }
 0x8ab   :  { %2698 = vmatprep.subr.bf16.mxu0 %v3377_v37 }
 0x8ae   :  { %2699 = vmatpush3.bf16.msra.mxu0 %v2880_v36 }
 0x8af   :  { %2700 = vmatprep.subr.bf16.mxu0 %v3377_v37 }
 0x8b2   :  { %2701 = vmatpush3.bf16.msra.mxu0 %v2881_v38 }
 0x8b3   :  { %2702 = vmatprep.subr.bf16.mxu0 %v3377_v37 }
 0x8b6   :  { %2703 = vmatpush3.bf16.msra.mxu0 %v2882_v30 }
 0x8b7   :  { %2704 = vmatprep.subr.bf16.mxu0 %v3377_v37 }
 0x8b8   :  { %v1705_v40 = vpop.f32.mrb[24].mxu1 }
 0x8b9   :  { %v2751_v41 = vadd.f32 %v2272_v39, %v1705_v40  ;;  %v2668_v42 = vpop.f32.mrb[25].mxu1 }
 0x8ba   :  { %v1708_v43 = vpop.f32.mrb[26].mxu1  ;;  %2705 = vmatpush3.bf16.msra.mxu0 %v2883_v46 }
 0x8bb   :  { %v1937_v44 = vpack.c.bf16 %v2751_v41, %v2751_v41  ;;  %v2669_v45 = vpop.f32.mrb[27].mxu1  ;;  %2730 = vmatprep.subr.bf16.mxu0 %v3377_v37 }
 0x8bd   :  { %2727 = vmatmul.mubr.bf16.vlgmr.msra.gmra.mrb[28].mxu1 %v1937_v44 }
 0x970   :  { %v1818_v49 = vpop.f32.mrb[24].mxu0 }
 0x971   :  { %v1819_v50 = vadd.f32 %v2289_v48, %v1818_v49  ;;  %v2688_v51 = vpop.f32.mrb[25].mxu0 }
 0x972   :  { %v1821_v52 = vpop.f32.mrb[26].mxu0 }
 0x973   :  { %v1824_v53 = vmax.f32 %v1819_v50, 0.0  ;;  %v2689_v54 = vpop.f32.mrb[27].mxu0 }
 0x975   :  { %v1825_v56 = vpack.c.bf16 %v1824_v53, %v1824_v53 }
 0x977   :  { %2707 = vmatmul.mubr.bf16.vlgmr.msra.gmra.mrb[28].mxu0 %v1825_v56 }
 0x978   :  { %2731 = vmatpush3.bf16.msra.mxu0 %v2884_v55  ;;  %2746 = vmatprep.mubr.msk.bf16.mxu0 %vm3378_vm15, %v3377_v37 }
 0x979   :  { %2732 = vmatprep.subr.bf16.mxu0 %v3377_v37 }
 0x97c   :  { %2733 = vmatpush3.bf16.msra.mxu0 %v2885_v57 }
 0x97d   :  { %2734 = vmatprep.subr.bf16.mxu0 %v3377_v37 }
 0x980   :  { %2735 = vmatpush3.bf16.msra.mxu0 %v2886_v62 }
 0x981   :  { %2736 = vmatprep.subr.bf16.mxu0 %v3377_v37 }
 0x984   :  { %2737 = vmatpush3.bf16.msra.mxu0 %v2887_v58 }
 0x985   :  { %2738 = vmatprep.subr.bf16.mxu0 %v3377_v37 }
 0x988   :  { %2739 = vmatpush3.bf16.msra.mxu0 %v2888_v59 }
 0x989   :  { %2740 = vmatprep.subr.bf16.mxu0 %v3377_v37 }
 0x98c   :  { %2741 = vmatpush3.bf16.msra.mxu0 %v2889_v60 }
 0x98d   :  { %2742 = vmatprep.subr.bf16.mxu0 %v3377_v37 }
 0x990   :  { %v2043_v0 = vpop.f32.mrb[28].mxu1  ;;  %2743 = vmatpush3.bf16.msra.mxu0 %v2890_v61 }
 0x991   :  { %v2044_v2 = vadd.f32 %v2307_v63, %v2043_v0  ;;  %v2728_v3 = vpop.f32.mrb[29].mxu1  ;;  %2744 = vmatprep.subr.bf16.mxu0 %v3377_v37 }
 0x992   :  { %v2046_v4 = vpop.f32.mrb[30].mxu1 }
 0x993   :  { %v2049_v5 = vmax.f32 %v2044_v2, 0.0  ;;  %v2729_v6 = vpop.f32.mrb[31].mxu1 }
 0x994   :  { %2745 = vmatpush3.bf16.msra.mxu0 %v2891_v1 }
 0x995   :  { %v2050_v7 = vpack.c.bf16 %v2049_v5, %v2049_v5 }
 0x997   :  { %2747 = vmatmul.mubr.bf16.vlgmr.msra.gmra.mrb[32].mxu0 %v2050_v7 }
 0xa4a   :  { %v1931_v8 = vpop.f32.mrb[28].mxu0 }
 0xa4b   :  { %v2708_v9 = vpop.f32.mrb[29].mxu0  ;;  %v1932_v16 = vadd.f32 %v2298_v13, %v1931_v8 }
 0xa4c   :  { %v1934_v10 = vpop.f32.mrb[30].mxu0 }
 0xa4d   :  { %v2709_v11 = vpop.f32.mrb[31].mxu0 }
 0xa6a   :  { %v2156_v15 = vpop.f32.mrb[32].mxu0 }
 0xa6b   :  { %v2157_v17 = vadd.f32 %v2316_v14, %v2156_v15  ;;  %v2748_v37 = vpop.f32.mrb[33].mxu0 }
 0xa6c   :  { %v2159_v18 = vpop.f32.mrb[34].mxu0 }
 0xa6d   :  { %v2169_v19 = vsel %vm2166_vm3, %v2157_v17, %v1932_v16  ;;  %v2749_v20 = vpop.f32.mrb[35].mxu0 }
 0xa6e   :  { %2170 = vst [vmem:[#allocation32] sm:$0x3] %v2169_v19 }
 0xa6f   :  { %3323 = shalt.err (!%p3320_p2)
}
 0xa70   :  { %s4184_s10 = sld [smem:[#allocation56_spill]] }
 0xa76   :  { %s3324_s4 = scalar_lea.hbm %s4184_s10, 32 }
 0xa77   :  { %p3325_p3 = scmp.ne.s32.totalorder %s4184_s10, %s3324_s4  ;;  %p3328_p4 = scmp.lt.u32.totalorder %s3324_s4, %s4184_s10 }
 0xa79   :  { %p3330_p5 = pnand %p3328_p4, %p3325_p3 }
 0xa7b   :  { %3333 = shalt.err (!%p3330_p5)
}
 0xa7c   :  { %2180 = dma.vmem_to_hbm [thread:$0]  %s2178_s7, 32, %s4184_s10, [#allocation4]  }
 0xa7d   :  { %3354 = dma.done.wait [#allocation4], 32  }
 0xa7e   :  { %3355 = vsyncadd [#allocation4], 4294967264 }
 0xa7f   :  { %2184 = vsyncpa [#allocation3], 1 }
 0xa80   :  { %2185 = vsyncpa [#allocation6], 1 }
 0xa81   :  { %2186 = vsyncpa [#allocation9], 1 }
 0xa82   :  { %2187 = vsyncpa [#allocation12], 1 }
 0xa83   :  { %2188 = vsyncpa [#allocation15], 1 }
 0xa84   :  { %2189 = vsyncpa [#allocation18], 1 }
 0xa85   :  { %2190 = vsyncpa [#allocation21], 1 }
 0xa86   :  { %2191 = vsyncpa [#allocation24], 1 }
 0xa87   :  { %2192 = vsyncpa [#allocation27], 1 }
 0xa88   :  { %2193 = vsyncpa [#allocation30], 1 }
 0xa89   :  { %2194 = vsyncpa [#allocation4], 1 }

</bundles_post_ra>
